<compile_context>
chip_gen: v6e
topology: v6e:2x2x1
jax: 0.10.0
libtpu: 0.0.40
codegen_flags: <defaults>
</compile_context>

<pallas_src>
import jax
import jax.numpy as jnp
from jax.experimental import pallas as pl
from jax.experimental.pallas import tpu as pltpu

_LANES = 128      # TPU lane width -> channel tile
_SUBLANES = 8     # sublane strip height used inside the kernel


def _round_up(x, m):
    return (x + m - 1) // m * m


def _dwconv3x3_kernel(xb_ref, xh_ref, w_ref, b_ref, o_ref):
    """One (batch, channel-tile, row-tile) step of the depthwise 3x3 conv.

    xb_ref: (1, TH, W+2, CT)  body rows [r*TH, r*TH+TH) of the pre-padded input
    xh_ref: (1, 2,  W+2, CT)  halo rows [r*TH+TH, r*TH+TH+2) of the padded input
    w_ref:  (3, 3, CT)        depthwise taps for this channel tile
    b_ref:  (1, CT)           bias for this channel tile
    o_ref:  (1, TH, W, CT)    output rows [r*TH, r*TH+TH)
    """
    _, TH, W, CT = o_ref.shape

    taps = w_ref[...].astype(jnp.float32)     # (3, 3, CT)
    bias = b_ref[0].astype(jnp.float32)       # (CT,)

    # Process the tile in 8-row (sublane) strips so the f32 accumulator stays
    # small (register-resident) instead of a whole-tile spilled accumulator.
    for s in range(0, TH, _SUBLANES):
        sh = _SUBLANES                        # TH is a multiple of 8
        if s + sh + 2 <= TH:
            xin = xb_ref[0, s:s + sh + 2, :, :]
        else:
            # Last strip of the tile: take the 2 extra rows from the halo block.
            extra = s + sh + 2 - TH           # == 2 for the last strip
            xin = jnp.concatenate(
                [xb_ref[0, s:TH, :, :], xh_ref[0, 0:extra, :, :]], axis=0)
        xin = xin.astype(jnp.float32)         # (sh+2, W+2, CT)

        # Pre-align the three column-shifted views once per strip (the kx shift
        # moves the sublane axis) instead of 9 misaligned window slices.
        cols = [xin[:, kx:kx + W, :] for kx in range(3)]   # each (sh+2, W, CT)

        acc = jnp.zeros((sh, W, CT), jnp.float32)
        for ky in range(3):
            for kx in range(3):
                # Row (ky) shift only selects whole vregs -> free.
                acc = acc + cols[kx][ky:ky + sh] * taps[ky, kx]
        acc = acc + bias

        o_ref[:, s:s + sh, :, :] = acc[None].astype(o_ref.dtype)


def dwconv_pallas_nhwc(x_nhwc, w_hwc, bias):
    """Depthwise 3x3 conv, stride 1, pad 1, bias — NHWC layout (TPU native).

    x_nhwc: (N, H, W, C);  w_hwc: (3, 3, C);  bias: (C,)  ->  (N, H, W, C)
    """
    N, H, W, C = x_nhwc.shape
    dtype = x_nhwc.dtype
    itemsize = jnp.dtype(dtype).itemsize

    # Lane-dense channels: pad to a multiple of 128 (no-op for dim=128k, e.g. 768).
    Cp = _round_up(C, _LANES)
    CT = _LANES

    # Row tile: multiple of 8, bounded so per-step VMEM (double-buffered in + out)
    # stays well under the smallest default scoped-VMEM limit (16 MiB on v5e).
    TH = min(32, _round_up(H, _SUBLANES))

    def _vmem_estimate(th):
        body = th * (W + 2) * CT * itemsize
        halo = 2 * (W + 2) * CT * itemsize
        out = th * W * CT * itemsize
        return 2 * (body + halo + out)

    while TH > _SUBLANES and _vmem_estimate(TH) > 10 * 2**20:
        TH -= _SUBLANES

    Hp = _round_up(H, TH)     # rows padded so every row tile is full (extra rows sliced off)
    R = Hp // TH

    # Pre-pad once in the wrapper (fused with the layout transform by XLA):
    # 1-row/col zero halo + bottom row padding to a multiple of TH + channel padding.
    x_pad = jnp.pad(x_nhwc, ((0, 0), (1, Hp - H + 1), (1, 1), (0, Cp - C)))  # (N, Hp+2, W+2, Cp)
    w_p = jnp.pad(w_hwc, ((0, 0), (0, 0), (0, Cp - C)))                      # (3, 3, Cp)
    b_p = jnp.pad(bias, (0, Cp - C)).reshape(1, Cp)                          # (1, Cp)

    grid = (N, Cp // CT, R)

    out = pl.pallas_call(
        _dwconv3x3_kernel,
        out_shape=jax.ShapeDtypeStruct((N, Hp, W, Cp), dtype),
        grid_spec=pltpu.PrefetchScalarGridSpec(
            num_scalar_prefetch=0,
            grid=grid,
            in_specs=[
                # body rows [r*TH, r*TH+TH) of the pre-padded input
                pl.BlockSpec((1, TH, W + 2, CT), lambda n, c, r: (n, r, 0, c)),
                # 2 halo rows just below the body; TH is even so the block index
                # (block size 2) lands exactly on element offset (r+1)*TH.
                pl.BlockSpec((1, 2, W + 2, CT),
                             lambda n, c, r: (n, (r + 1) * (TH // 2), 0, c)),
                pl.BlockSpec((3, 3, CT), lambda n, c, r: (0, 0, c)),
                pl.BlockSpec((1, CT), lambda n, c, r: (0, c)),
            ],
            out_specs=pl.BlockSpec((1, TH, W, CT), lambda n, c, r: (n, r, 0, c)),
        ),
        compiler_params=pltpu.CompilerParams(
            dimension_semantics=("parallel", "parallel", "parallel")),
    )(x_pad, x_pad, w_p, b_p)

    return out[:, :H, :, :C]


def dwconv_pallas(x_nchw, weight, bias):
    """PyTorch-parity entry point (NCHW in/out, nn.Conv2d(C, C, 3, 1, 1, groups=C) params).

    The NCHW<->NHWC transposes exist only for drop-in parity with the PyTorch module;
    in a full model keep activations NHWC end-to-end and call dwconv_pallas_nhwc.
    """
    x = jnp.transpose(x_nchw, (0, 2, 3, 1))            # (N, H, W, C)
    w = jnp.transpose(weight[:, 0, :, :], (1, 2, 0))   # (3, 3, C)
    out = dwconv_pallas_nhwc(x, w, bias)
    return jnp.transpose(out, (0, 3, 1, 2))            # (N, C, H, W)


def dwconv_reference(x_nchw, weight, bias):
    """Pure-JAX reference (lax depthwise conv) for correctness checking."""
    C = x_nchw.shape[1]
    return jax.lax.conv_general_dilated(
        x_nchw, weight,
        window_strides=(1, 1),
        padding=((1, 1), (1, 1)),
        feature_group_count=C,
        dimension_numbers=("NCHW", "OIHW", "NCHW"),
        precision=jax.lax.Precision.HIGHEST,
    ) + bias.reshape(1, C, 1, 1)


def _check(N, C, H, W, seed):
    key = jax.random.PRNGKey(seed)
    kx, kw, kb = jax.random.split(key, 3)
    x = jax.random.normal(kx, (N, C, H, W), dtype=jnp.float32)
    weight = jax.random.normal(kw, (C, 1, 3, 3), dtype=jnp.float32) * 0.1
    bias = jax.random.normal(kb, (C,), dtype=jnp.float32) * 0.1

    out = jax.block_until_ready(dwconv_pallas(x, weight, bias))
    ref = jax.block_until_ready(dwconv_reference(x, weight, bias))
    assert out.shape == (N, C, H, W)
    assert jnp.allclose(out, ref, atol=1e-4, rtol=1e-4), \
        f"mismatch vs reference for shape {(N, C, H, W)}"


if __name__ == "__main__":
    # Primary small shape consistent with the module (dim = channels = 4).
    _check(2, 4, 16, 16, seed=0)
    # Extra shape exercising multiple channel tiles (C>128) and multiple row tiles.
    _check(1, 130, 40, 24, seed=0)
    print("KERNEL_OK")
</pallas_src>

<mosaic_0001>
module attributes {stable_mosaic.version = 11 : i64} {
  func.func @_dwconv3x3_kernel(%arg0: i32, %arg1: i32, %arg2: i32, %arg3: memref<1x16x18x128xf32, #tpu.memory_space<vmem>>, %arg4: memref<1x2x18x128xf32, #tpu.memory_space<vmem>>, %arg5: memref<3x3x128xf32, #tpu.memory_space<vmem>>, %arg6: memref<1x128xf32, #tpu.memory_space<vmem>>, %arg7: memref<1x16x16x128xf32, #tpu.memory_space<vmem>>) attributes {dimension_semantics = [#tpu.dimension_semantics<parallel>, #tpu.dimension_semantics<parallel>, #tpu.dimension_semantics<parallel>], iteration_bounds = array<i64: 2, 1, 1>, scalar_prefetch = 0 : i64, scratch_operands = 0 : i64, tpu.core_type = #tpu.core_type<tc>, window_params = [{transform_indices = @transform_0, window_bounds = array<i64: 1, 16, 18, 128>}, {transform_indices = @transform_1, window_bounds = array<i64: 1, 2, 18, 128>}, {transform_indices = @transform_2, window_bounds = array<i64: 3, 3, 128>}, {transform_indices = @transform_3, window_bounds = array<i64: 1, 128>}, {transform_indices = @transform_4, window_bounds = array<i64: 1, 16, 16, 128>}]} {
    %c0 = arith.constant 0 : index
    %c0_0 = arith.constant 0 : index
    %c0_1 = arith.constant 0 : index
    %0 = vector.load %arg5[%c0, %c0_0, %c0_1] : memref<3x3x128xf32, #tpu.memory_space<vmem>>, vector<3x3x128xf32>
    %c0_2 = arith.constant 0 : index
    %c0_3 = arith.constant 0 : index
    %1 = vector.load %arg6[%c0_2, %c0_3] : memref<1x128xf32, #tpu.memory_space<vmem>>, vector<1x128xf32>
    %2 = vector.shape_cast %1 : vector<1x128xf32> to vector<128xf32>
    %c0_4 = arith.constant 0 : index
    %c0_5 = arith.constant 0 : index
    %c0_6 = arith.constant 0 : index
    %c0_7 = arith.constant 0 : index
    %3 = vector.load %arg3[%c0_4, %c0_5, %c0_6, %c0_7] : memref<1x16x18x128xf32, #tpu.memory_space<vmem>>, vector<1x10x18x128xf32>
    %4 = vector.shape_cast %3 : vector<1x10x18x128xf32> to vector<10x18x128xf32>
    %5 = vector.extract_strided_slice %4 {offsets = [0, 0, 0], sizes = [10, 16, 128], strides = [1, 1, 1]} : vector<10x18x128xf32> to vector<10x16x128xf32>
    %6 = vector.extract_strided_slice %4 {offsets = [0, 1, 0], sizes = [10, 16, 128], strides = [1, 1, 1]} : vector<10x18x128xf32> to vector<10x16x128xf32>
    %7 = vector.extract_strided_slice %4 {offsets = [0, 2, 0], sizes = [10, 16, 128], strides = [1, 1, 1]} : vector<10x18x128xf32> to vector<10x16x128xf32>
    %cst = arith.constant 0.000000e+00 : f32
    %8 = vector.broadcast %cst : f32 to vector<8x16x128xf32>
    %9 = vector.extract_strided_slice %5 {offsets = [0, 0, 0], sizes = [8, 16, 128], strides = [1, 1, 1]} : vector<10x16x128xf32> to vector<8x16x128xf32>
    %10 = vector.extract_strided_slice %0 {offsets = [0, 0, 0], sizes = [1, 1, 128], strides = [1, 1, 1]} : vector<3x3x128xf32> to vector<1x1x128xf32>
    %11 = vector.shape_cast %10 : vector<1x1x128xf32> to vector<128xf32>
    %12 = vector.shape_cast %11 : vector<128xf32> to vector<1x1x128xf32>
    %13 = vector.broadcast %12 : vector<1x1x128xf32> to vector<8x16x128xf32>
    %14 = arith.mulf %9, %13 : vector<8x16x128xf32>
    %15 = arith.addf %8, %14 : vector<8x16x128xf32>
    %16 = vector.extract_strided_slice %6 {offsets = [0, 0, 0], sizes = [8, 16, 128], strides = [1, 1, 1]} : vector<10x16x128xf32> to vector<8x16x128xf32>
    %17 = vector.extract_strided_slice %0 {offsets = [0, 1, 0], sizes = [1, 1, 128], strides = [1, 1, 1]} : vector<3x3x128xf32> to vector<1x1x128xf32>
    %18 = vector.shape_cast %17 : vector<1x1x128xf32> to vector<128xf32>
    %19 = vector.shape_cast %18 : vector<128xf32> to vector<1x1x128xf32>
    %20 = vector.broadcast %19 : vector<1x1x128xf32> to vector<8x16x128xf32>
    %21 = arith.mulf %16, %20 : vector<8x16x128xf32>
    %22 = arith.addf %15, %21 : vector<8x16x128xf32>
    %23 = vector.extract_strided_slice %7 {offsets = [0, 0, 0], sizes = [8, 16, 128], strides = [1, 1, 1]} : vector<10x16x128xf32> to vector<8x16x128xf32>
    %24 = vector.extract_strided_slice %0 {offsets = [0, 2, 0], sizes = [1, 1, 128], strides = [1, 1, 1]} : vector<3x3x128xf32> to vector<1x1x128xf32>
    %25 = vector.shape_cast %24 : vector<1x1x128xf32> to vector<128xf32>
    %26 = vector.shape_cast %25 : vector<128xf32> to vector<1x1x128xf32>
    %27 = vector.broadcast %26 : vector<1x1x128xf32> to vector<8x16x128xf32>
    %28 = arith.mulf %23, %27 : vector<8x16x128xf32>
    %29 = arith.addf %22, %28 : vector<8x16x128xf32>
    %30 = vector.extract_strided_slice %5 {offsets = [1, 0, 0], sizes = [8, 16, 128], strides = [1, 1, 1]} : vector<10x16x128xf32> to vector<8x16x128xf32>
    %31 = vector.extract_strided_slice %0 {offsets = [1, 0, 0], sizes = [1, 1, 128], strides = [1, 1, 1]} : vector<3x3x128xf32> to vector<1x1x128xf32>
    %32 = vector.shape_cast %31 : vector<1x1x128xf32> to vector<128xf32>
    %33 = vector.shape_cast %32 : vector<128xf32> to vector<1x1x128xf32>
    %34 = vector.broadcast %33 : vector<1x1x128xf32> to vector<8x16x128xf32>
    %35 = arith.mulf %30, %34 : vector<8x16x128xf32>
    %36 = arith.addf %29, %35 : vector<8x16x128xf32>
    %37 = vector.extract_strided_slice %6 {offsets = [1, 0, 0], sizes = [8, 16, 128], strides = [1, 1, 1]} : vector<10x16x128xf32> to vector<8x16x128xf32>
    %38 = vector.extract_strided_slice %0 {offsets = [1, 1, 0], sizes = [1, 1, 128], strides = [1, 1, 1]} : vector<3x3x128xf32> to vector<1x1x128xf32>
    %39 = vector.shape_cast %38 : vector<1x1x128xf32> to vector<128xf32>
    %40 = vector.shape_cast %39 : vector<128xf32> to vector<1x1x128xf32>
    %41 = vector.broadcast %40 : vector<1x1x128xf32> to vector<8x16x128xf32>
    %42 = arith.mulf %37, %41 : vector<8x16x128xf32>
    %43 = arith.addf %36, %42 : vector<8x16x128xf32>
    %44 = vector.extract_strided_slice %7 {offsets = [1, 0, 0], sizes = [8, 16, 128], strides = [1, 1, 1]} : vector<10x16x128xf32> to vector<8x16x128xf32>
    %45 = vector.extract_strided_slice %0 {offsets = [1, 2, 0], sizes = [1, 1, 128], strides = [1, 1, 1]} : vector<3x3x128xf32> to vector<1x1x128xf32>
    %46 = vector.shape_cast %45 : vector<1x1x128xf32> to vector<128xf32>
    %47 = vector.shape_cast %46 : vector<128xf32> to vector<1x1x128xf32>
    %48 = vector.broadcast %47 : vector<1x1x128xf32> to vector<8x16x128xf32>
    %49 = arith.mulf %44, %48 : vector<8x16x128xf32>
    %50 = arith.addf %43, %49 : vector<8x16x128xf32>
    %51 = vector.extract_strided_slice %5 {offsets = [2, 0, 0], sizes = [8, 16, 128], strides = [1, 1, 1]} : vector<10x16x128xf32> to vector<8x16x128xf32>
    %52 = vector.extract_strided_slice %0 {offsets = [2, 0, 0], sizes = [1, 1, 128], strides = [1, 1, 1]} : vector<3x3x128xf32> to vector<1x1x128xf32>
    %53 = vector.shape_cast %52 : vector<1x1x128xf32> to vector<128xf32>
    %54 = vector.shape_cast %53 : vector<128xf32> to vector<1x1x128xf32>
    %55 = vector.broadcast %54 : vector<1x1x128xf32> to vector<8x16x128xf32>
    %56 = arith.mulf %51, %55 : vector<8x16x128xf32>
    %57 = arith.addf %50, %56 : vector<8x16x128xf32>
    %58 = vector.extract_strided_slice %6 {offsets = [2, 0, 0], sizes = [8, 16, 128], strides = [1, 1, 1]} : vector<10x16x128xf32> to vector<8x16x128xf32>
    %59 = vector.extract_strided_slice %0 {offsets = [2, 1, 0], sizes = [1, 1, 128], strides = [1, 1, 1]} : vector<3x3x128xf32> to vector<1x1x128xf32>
    %60 = vector.shape_cast %59 : vector<1x1x128xf32> to vector<128xf32>
    %61 = vector.shape_cast %60 : vector<128xf32> to vector<1x1x128xf32>
    %62 = vector.broadcast %61 : vector<1x1x128xf32> to vector<8x16x128xf32>
    %63 = arith.mulf %58, %62 : vector<8x16x128xf32>
    %64 = arith.addf %57, %63 : vector<8x16x128xf32>
    %65 = vector.extract_strided_slice %7 {offsets = [2, 0, 0], sizes = [8, 16, 128], strides = [1, 1, 1]} : vector<10x16x128xf32> to vector<8x16x128xf32>
    %66 = vector.extract_strided_slice %0 {offsets = [2, 2, 0], sizes = [1, 1, 128], strides = [1, 1, 1]} : vector<3x3x128xf32> to vector<1x1x128xf32>
    %67 = vector.shape_cast %66 : vector<1x1x128xf32> to vector<128xf32>
    %68 = vector.shape_cast %67 : vector<128xf32> to vector<1x1x128xf32>
    %69 = vector.broadcast %68 : vector<1x1x128xf32> to vector<8x16x128xf32>
    %70 = arith.mulf %65, %69 : vector<8x16x128xf32>
    %71 = arith.addf %64, %70 : vector<8x16x128xf32>
    %72 = vector.shape_cast %2 : vector<128xf32> to vector<1x1x128xf32>
    %73 = vector.broadcast %72 : vector<1x1x128xf32> to vector<8x16x128xf32>
    %74 = arith.addf %71, %73 : vector<8x16x128xf32>
    %75 = vector.shape_cast %74 : vector<8x16x128xf32> to vector<1x8x16x128xf32>
    %c0_8 = arith.constant 0 : index
    %c0_9 = arith.constant 0 : index
    %c0_10 = arith.constant 0 : index
    %c0_11 = arith.constant 0 : index
    %76 = vector.load %arg7[%c0_8, %c0_9, %c0_10, %c0_11] : memref<1x16x16x128xf32, #tpu.memory_space<vmem>>, vector<1x8x16x128xf32>
    tpu.vector_store %arg7[%c0_8, %c0_9, %c0_10, %c0_11], %75 {strides = array<i32>} : memref<1x16x16x128xf32, #tpu.memory_space<vmem>>, vector<1x8x16x128xf32>,
    %c0_12 = arith.constant 0 : index
    %c8 = arith.constant 8 : index
    %c0_13 = arith.constant 0 : index
    %c0_14 = arith.constant 0 : index
    %77 = vector.load %arg3[%c0_12, %c8, %c0_13, %c0_14] : memref<1x16x18x128xf32, #tpu.memory_space<vmem>>, vector<1x8x18x128xf32>
    %78 = vector.shape_cast %77 : vector<1x8x18x128xf32> to vector<8x18x128xf32>
    %c0_15 = arith.constant 0 : index
    %c0_16 = arith.constant 0 : index
    %c0_17 = arith.constant 0 : index
    %c0_18 = arith.constant 0 : index
    %79 = vector.load %arg4[%c0_15, %c0_16, %c0_17, %c0_18] : memref<1x2x18x128xf32, #tpu.memory_space<vmem>>, vector<1x2x18x128xf32>
    %80 = vector.shape_cast %79 : vector<1x2x18x128xf32> to vector<2x18x128xf32>
    %81 = tpu.concatenate %78, %80 in 0 : vector<8x18x128xf32>, vector<2x18x128xf32> -> vector<10x18x128xf32>
    %82 = vector.extract_strided_slice %81 {offsets = [0, 0, 0], sizes = [10, 16, 128], strides = [1, 1, 1]} : vector<10x18x128xf32> to vector<10x16x128xf32>
    %83 = vector.extract_strided_slice %81 {offsets = [0, 1, 0], sizes = [10, 16, 128], strides = [1, 1, 1]} : vector<10x18x128xf32> to vector<10x16x128xf32>
    %84 = vector.extract_strided_slice %81 {offsets = [0, 2, 0], sizes = [10, 16, 128], strides = [1, 1, 1]} : vector<10x18x128xf32> to vector<10x16x128xf32>
    %cst_19 = arith.constant 0.000000e+00 : f32
    %85 = vector.broadcast %cst_19 : f32 to vector<8x16x128xf32>
    %86 = vector.extract_strided_slice %82 {offsets = [0, 0, 0], sizes = [8, 16, 128], strides = [1, 1, 1]} : vector<10x16x128xf32> to vector<8x16x128xf32>
    %87 = vector.extract_strided_slice %0 {offsets = [0, 0, 0], sizes = [1, 1, 128], strides = [1, 1, 1]} : vector<3x3x128xf32> to vector<1x1x128xf32>
    %88 = vector.shape_cast %87 : vector<1x1x128xf32> to vector<128xf32>
    %89 = vector.shape_cast %88 : vector<128xf32> to vector<1x1x128xf32>
    %90 = vector.broadcast %89 : vector<1x1x128xf32> to vector<8x16x128xf32>
    %91 = arith.mulf %86, %90 : vector<8x16x128xf32>
    %92 = arith.addf %85, %91 : vector<8x16x128xf32>
    %93 = vector.extract_strided_slice %83 {offsets = [0, 0, 0], sizes = [8, 16, 128], strides = [1, 1, 1]} : vector<10x16x128xf32> to vector<8x16x128xf32>
    %94 = vector.extract_strided_slice %0 {offsets = [0, 1, 0], sizes = [1, 1, 128], strides = [1, 1, 1]} : vector<3x3x128xf32> to vector<1x1x128xf32>
    %95 = vector.shape_cast %94 : vector<1x1x128xf32> to vector<128xf32>
    %96 = vector.shape_cast %95 : vector<128xf32> to vector<1x1x128xf32>
    %97 = vector.broadcast %96 : vector<1x1x128xf32> to vector<8x16x128xf32>
    %98 = arith.mulf %93, %97 : vector<8x16x128xf32>
    %99 = arith.addf %92, %98 : vector<8x16x128xf32>
    %100 = vector.extract_strided_slice %84 {offsets = [0, 0, 0], sizes = [8, 16, 128], strides = [1, 1, 1]} : vector<10x16x128xf32> to vector<8x16x128xf32>
    %101 = vector.extract_strided_slice %0 {offsets = [0, 2, 0], sizes = [1, 1, 128], strides = [1, 1, 1]} : vector<3x3x128xf32> to vector<1x1x128xf32>
    %102 = vector.shape_cast %101 : vector<1x1x128xf32> to vector<128xf32>
    %103 = vector.shape_cast %102 : vector<128xf32> to vector<1x1x128xf32>
    %104 = vector.broadcast %103 : vector<1x1x128xf32> to vector<8x16x128xf32>
    %105 = arith.mulf %100, %104 : vector<8x16x128xf32>
    %106 = arith.addf %99, %105 : vector<8x16x128xf32>
    %107 = vector.extract_strided_slice %82 {offsets = [1, 0, 0], sizes = [8, 16, 128], strides = [1, 1, 1]} : vector<10x16x128xf32> to vector<8x16x128xf32>
    %108 = vector.extract_strided_slice %0 {offsets = [1, 0, 0], sizes = [1, 1, 128], strides = [1, 1, 1]} : vector<3x3x128xf32> to vector<1x1x128xf32>
    %109 = vector.shape_cast %108 : vector<1x1x128xf32> to vector<128xf32>
    %110 = vector.shape_cast %109 : vector<128xf32> to vector<1x1x128xf32>
    %111 = vector.broadcast %110 : vector<1x1x128xf32> to vector<8x16x128xf32>
    %112 = arith.mulf %107, %111 : vector<8x16x128xf32>
    %113 = arith.addf %106, %112 : vector<8x16x128xf32>
    %114 = vector.extract_strided_slice %83 {offsets = [1, 0, 0], sizes = [8, 16, 128], strides = [1, 1, 1]} : vector<10x16x128xf32> to vector<8x16x128xf32>
    %115 = vector.extract_strided_slice %0 {offsets = [1, 1, 0], sizes = [1, 1, 128], strides = [1, 1, 1]} : vector<3x3x128xf32> to vector<1x1x128xf32>
    %116 = vector.shape_cast %115 : vector<1x1x128xf32> to vector<128xf32>
    %117 = vector.shape_cast %116 : vector<128xf32> to vector<1x1x128xf32>
    %118 = vector.broadcast %117 : vector<1x1x128xf32> to vector<8x16x128xf32>
    %119 = arith.mulf %114, %118 : vector<8x16x128xf32>
    %120 = arith.addf %113, %119 : vector<8x16x128xf32>
    %121 = vector.extract_strided_slice %84 {offsets = [1, 0, 0], sizes = [8, 16, 128], strides = [1, 1, 1]} : vector<10x16x128xf32> to vector<8x16x128xf32>
    %122 = vector.extract_strided_slice %0 {offsets = [1, 2, 0], sizes = [1, 1, 128], strides = [1, 1, 1]} : vector<3x3x128xf32> to vector<1x1x128xf32>
    %123 = vector.shape_cast %122 : vector<1x1x128xf32> to vector<128xf32>
    %124 = vector.shape_cast %123 : vector<128xf32> to vector<1x1x128xf32>
    %125 = vector.broadcast %124 : vector<1x1x128xf32> to vector<8x16x128xf32>
    %126 = arith.mulf %121, %125 : vector<8x16x128xf32>
    %127 = arith.addf %120, %126 : vector<8x16x128xf32>
    %128 = vector.extract_strided_slice %82 {offsets = [2, 0, 0], sizes = [8, 16, 128], strides = [1, 1, 1]} : vector<10x16x128xf32> to vector<8x16x128xf32>
    %129 = vector.extract_strided_slice %0 {offsets = [2, 0, 0], sizes = [1, 1, 128], strides = [1, 1, 1]} : vector<3x3x128xf32> to vector<1x1x128xf32>
    %130 = vector.shape_cast %129 : vector<1x1x128xf32> to vector<128xf32>
    %131 = vector.shape_cast %130 : vector<128xf32> to vector<1x1x128xf32>
    %132 = vector.broadcast %131 : vector<1x1x128xf32> to vector<8x16x128xf32>
    %133 = arith.mulf %128, %132 : vector<8x16x128xf32>
    %134 = arith.addf %127, %133 : vector<8x16x128xf32>
    %135 = vector.extract_strided_slice %83 {offsets = [2, 0, 0], sizes = [8, 16, 128], strides = [1, 1, 1]} : vector<10x16x128xf32> to vector<8x16x128xf32>
    %136 = vector.extract_strided_slice %0 {offsets = [2, 1, 0], sizes = [1, 1, 128], strides = [1, 1, 1]} : vector<3x3x128xf32> to vector<1x1x128xf32>
    %137 = vector.shape_cast %136 : vector<1x1x128xf32> to vector<128xf32>
    %138 = vector.shape_cast %137 : vector<128xf32> to vector<1x1x128xf32>
    %139 = vector.broadcast %138 : vector<1x1x128xf32> to vector<8x16x128xf32>
    %140 = arith.mulf %135, %139 : vector<8x16x128xf32>
    %141 = arith.addf %134, %140 : vector<8x16x128xf32>
    %142 = vector.extract_strided_slice %84 {offsets = [2, 0, 0], sizes = [8, 16, 128], strides = [1, 1, 1]} : vector<10x16x128xf32> to vector<8x16x128xf32>
    %143 = vector.extract_strided_slice %0 {offsets = [2, 2, 0], sizes = [1, 1, 128], strides = [1, 1, 1]} : vector<3x3x128xf32> to vector<1x1x128xf32>
    %144 = vector.shape_cast %143 : vector<1x1x128xf32> to vector<128xf32>
    %145 = vector.shape_cast %144 : vector<128xf32> to vector<1x1x128xf32>
    %146 = vector.broadcast %145 : vector<1x1x128xf32> to vector<8x16x128xf32>
    %147 = arith.mulf %142, %146 : vector<8x16x128xf32>
    %148 = arith.addf %141, %147 : vector<8x16x128xf32>
    %149 = vector.shape_cast %2 : vector<128xf32> to vector<1x1x128xf32>
    %150 = vector.broadcast %149 : vector<1x1x128xf32> to vector<8x16x128xf32>
    %151 = arith.addf %148, %150 : vector<8x16x128xf32>
    %152 = vector.shape_cast %151 : vector<8x16x128xf32> to vector<1x8x16x128xf32>
    %c0_20 = arith.constant 0 : index
    %c8_21 = arith.constant 8 : index
    %c0_22 = arith.constant 0 : index
    %c0_23 = arith.constant 0 : index
    %153 = vector.load %arg7[%c0_20, %c8_21, %c0_22, %c0_23] : memref<1x16x16x128xf32, #tpu.memory_space<vmem>>, vector<1x8x16x128xf32>
    tpu.vector_store %arg7[%c0_20, %c8_21, %c0_22, %c0_23], %152 {strides = array<i32>} : memref<1x16x16x128xf32, #tpu.memory_space<vmem>>, vector<1x8x16x128xf32>,
    return
  }
  func.func @transform_0(%arg0: i32, %arg1: i32, %arg2: i32) -> (i32, i32, i32, i32) {
    %c0_i32 = arith.constant 0 : i32
    %c0_i32_0 = arith.constant 0 : i32
    return %arg0, %arg2, %c0_i32, %arg1 : i32, i32, i32, i32
  }
  func.func @transform_1(%arg0: i32, %arg1: i32, %arg2: i32) -> (i32, i32, i32, i32) {
    %c1_i32 = arith.constant 1 : i32
    %0 = arith.addi %arg2, %c1_i32 : i32
    %c8_i32 = arith.constant 8 : i32
    %1 = arith.muli %0, %c8_i32 : i32
    %c0_i32 = arith.constant 0 : i32
    %c0_i32_0 = arith.constant 0 : i32
    return %arg0, %1, %c0_i32, %arg1 : i32, i32, i32, i32
  }
  func.func @transform_2(%arg0: i32, %arg1: i32, %arg2: i32) -> (i32, i32, i32) {
    %c0_i32 = arith.constant 0 : i32
    %c0_i32_0 = arith.constant 0 : i32
    %c0_i32_1 = arith.constant 0 : i32
    return %c0_i32, %c0_i32_0, %arg1 : i32, i32, i32
  }
  func.func @transform_3(%arg0: i32, %arg1: i32, %arg2: i32) -> (i32, i32) {
    %c0_i32 = arith.constant 0 : i32
    %c0_i32_0 = arith.constant 0 : i32
    return %c0_i32, %arg1 : i32, i32
  }
  func.func @transform_4(%arg0: i32, %arg1: i32, %arg2: i32) -> (i32, i32, i32, i32) {
    %c0_i32 = arith.constant 0 : i32
    %c0_i32_0 = arith.constant 0 : i32
    return %arg0, %arg2, %c0_i32, %arg1 : i32, i32, i32, i32
  }
}

</mosaic_0001>

<bundles_post_ra>
// kernel: tpu_custom_call.1
= control target key start
LH: loop header
LB: loop body
LE: loop exit
PB: predicated region body
PF: predicated region fallthrough
CT: control target
= control target key end

     0   :  { %9 = vsyncpa [#allocation3], 0  ;;  %s4082_s0 = inlined_call_operand.vmem [shape: f32[2,18,18,128], index: 0, kind: input, shape index: {}]   ;;  %s4083_s1 = inlined_call_operand.vmem [shape: f32[2,18,18,128], index: 1, kind: input, shape index: {}]   ;;  %s4084_s2 = inlined_call_operand.vmem [shape: f32[3,3,128], index: 2, kind: input, shape index: {}]   ;;  %s4085_s3 = inlined_call_operand.vmem [shape: f32[1,128], index: 3, kind: input, shape index: {}]   ;;  %s4086_s4 = inlined_call_operand.hbm [shape: f32[2,16,16,128], index: 4, kind: output, shape index: {}]  }
   0x1   :  { %11 = vsyncpa [#allocation3 + $0x1], 0  ;;  %s2561_s15 = smov 0   ;;  %s2563_s16 = smov 0  }
   0x2   :  { %s2565_s17 = smov 0   ;;  %s2567_s18 = smov 0  }
   0x3   :  { %s2569_s19 = smov 0   ;;  %s2571_s20 = smov 0  }
   0x4 LB: > { %s2334_s21 = sadd.s32 4294967295, %s2531_s20   ;;  %s2335_s22 = sadd.s32 4294967294, %s2531_s20   ;;  %s2531_s20 = sphi %s2571_s20, %s17_s20   ;;  %s2527_s19 = sphi %s2569_s19, %s4093_s19   ;;  %s2523_s18 = sphi %s2567_s18, %s4092_s18   ;;  %s2519_s17 = sphi %s2565_s17, %s4091_s17   ;;  %s2515_s16 = sphi %s2563_s16, %s4090_s16   ;;  %s2511_s15 = sphi %s2561_s15, %s4089_s15  }
   0x5   : > { %s36_s23 = sadd.s32 1, %s2527_s19  ;;  %s163_s24 = sadd.s32 1, %s2519_s17 }
   0x6   : > { %p38_p0 = scmp.ge.s32.totalorder %s36_s23, 2  ;;  %p173_p1 = scmp.ne.s32.totalorder %s2519_s17, %s2515_s16 }
   0x7   : > { %p174_p2 = scmp.eq.s32.totalorder %s2334_s21, 1  ;;  %p179_p3 = scmp.ne.s32.totalorder %s2515_s16, %s2511_s15 }
   0x8   : > { %s4095_s23 = smov (%p38_p0, %s36_s23), 0  ;;  %p180_p5 = scmp.eq.s32.totalorder %s2335_s22, 1 }
   0x9   : > { %p2601_p4 = por %p174_p2, %p173_p1  ;;  %s156_s26 = ssub.s32 %s2527_s19, %s4095_s23 }
   0xa   : > { %p2340_p6 = scmp.ge.s32.totalorder %s2531_s20, 1  ;;  %p161_p7 = scmp.eq.s32.totalorder %s156_s26, 0 }
   0xb   : > { %p2608_p8 = por %p180_p5, %p179_p3  ;;  %p259_p9 = scmp.lt.s32.totalorder %s2531_s20, 3 }
   0xc   : > { %s2614_s28 = scalar_select %p161_p7, %s2519_s17, %s163_s24  }
   0xd   : > { %p260_p10 = pnand %p2340_p6, %p259_p9 }
   0xe   : > { %p326_p11 = scmp.lt.s32.totalorder (!%p260_p10), %s2523_s18, 1  ;;  %s317_s14 = sand.u32 (!%p260_p10), 1, %s2515_s16  }
   0xf   : > { %263 = sbr.rel (%p260_p10) target bundleno = 343 (0x157), region = 36  ;;  %s2341_s21 = sshll.u32 (!%p260_p10), %s317_s14, 8 }
  0x10   : > { %s2776_s26 = scalar_lea.vmem (!%p260_p10), [#allocation2], %s2341_s21  ;;  %s2392_s11 = sshll.u32 (!%p260_p10), %s2523_s18, 12 }
  0x11   : > { %s2194_s12 = sshll.u32 (!%p260_p10), %s2776_s26, 4  ;;  %s4029_s22 = scalar_lea.hbm (!%p260_p10), %s4086_s4, %s2392_s11  ;;  %s4031_s12 = int_to_ptr.vmem [resolvable:$true] %s2194_s12 }
  0x12   : > { %s4037_s24 = scalar_lea.sflag (!%p260_p10), [#allocation3], %s317_s14  ;;  %s2455_s30 = scalar_lea.vmem (!%p260_p10), %s4031_s12, 4096 }
  0x13   : > { %p2456_p12 = scmp.ne.s32.totalorder (!%p260_p10), %s4031_s12, %s2455_s30 }
  0x14   : > { %v404_v0 = vlaneseq  ;;  %s2618_s29 = scalar_select %p326_p11, %s2523_s18, 1  ;;  %v370_v2 = vld [vmem:[%s4084_s2] sm:$0x7]  ;;  %v371_v3 = vld [vmem:[%s4084_s2 + $0x4] sm:$0x7]  ;;  %vm492_vm0 = vcmask 1046528  }
  0x15   : > { %v372_v7 = vld [vmem:[%s4084_s2 + $0x8] sm:$0x7]  ;;  %vm617_vm1 = vcmask 1045504   ;;  %p2457_p13 = pnand %p2456_p12, %p2601_p4  ;;  %s2533_s18 = smov [#allocation2]  }
  0x16   : > { %v405_v1 = vshrl.u32 %v404_v0, 7  ;;  %s2393_s8 = smul.u32 432, %s2618_s29  ;;  %s2459_s5 = sshll.u32 %s2533_s18, 4  ;;  %s2460_s5 = int_to_ptr.vmem [resolvable:$false] %s2459_s5 }
  0x17   : > { %p2458_p0 = pneg %p2457_p13  ;;  %p2462_p1 = scmp.lt.s32.totalorder %s4031_s12, %s2460_s5 }
  0x18   : > { %v406_v4 = vsub.s32 0, %v405_v1  ;;  %v442_v5 = vsub.s32 1, %v405_v1  ;;  %v567_v6 = vsub.s32 2, %v405_v1  ;;  %s2641_s13 = scalar_lea.vmem %s4082_s0, %s2393_s8  ;;  %s2391_s6 = sadd.s32 384, %s2393_s8 }
  0x19   : > { %v374_v13 = vld [vmem:[%s2641_s13] sm:$0xff]  ;;  %v375_v14 = vld [vmem:[%s2641_s13 + $0x8] sm:$0xff]  ;;  %v2656_v18 = vld [vmem:[%s2641_s13 + $0x18] sm:$0xff]  ;;  %s3880_s8 = scalar_lea.vmem %s4083_s1, %s2391_s6  ;;  %s2461_s6 = scalar_lea.vmem %s2460_s5, 8192 }
  0x1a   : > { %v2630_v8 = vrot.slane %v370_v2, %v406_v4  ;;  %v2632_v9 = vrot.slane %v370_v2, %v442_v5  ;;  %v2634_v10 = vrot.slane %v370_v2, %v567_v6  ;;  %v2643_v11 = vrot.slane %v371_v3, %v442_v5  ;;  %v2659_v19 = vld [vmem:[%s2641_s13 + $0x20] sm:$0xff]  ;;  %v2675_v32 = vld [vmem:[%s2641_s13 + $0x30] sm:$0xff]  ;;  %v2686_v42 = vld [vmem:[%s2641_s13 + $0x38] sm:$0xff]  ;;  %p2463_p2 = scmp.lt.s32.totalorder %s2461_s6, %s2455_s30 }
  0x1b   : > { %v2645_v12 = vrot.slane %v371_v3, %v567_v6  ;;  %v2649_v15 = vrot.slane %v371_v3, %v406_v4  ;;  %v2651_v16 = vrot.slane %v372_v7, %v406_v4  ;;  %v2653_v17 = vrot.slane %v372_v7, %v442_v5  ;;  %v376_v41 = vld [vmem:[%s2641_s13 + $0x10] sm:$0x3]  ;;  %v2704_v58 = vld [vmem:[%s2641_s13 + $0x28] sm:$0x3] }
  0x1c   : > { %v444_v20 = vmul.f32 %v2632_v9, %v374_v13  ;;  %v445_v21 = vmul.f32 %v2632_v9, %v375_v14  ;;  %v569_v22 = vmul.f32 %v2634_v10, %v374_v13  ;;  %v2664_v23 = vrot.slane %v372_v7, %v567_v6  ;;  %v2717_v6 = vld [vmem:[%s2641_s13 + $0x40] sm:$0x3]  ;;  %p2464_p3 = por %p2463_p2, %p2462_p1 }
  0x1d   : > { %v408_v24 = vmul.f32 %v2630_v8, %v374_v13  ;;  %v570_v25 = vmul.f32 %v2634_v10, %v375_v14  ;;  %v730_v26 = vmul.f32 %v2643_v11, %v2656_v18  ;;  %v731_v27 = vmul.f32 %v2643_v11, %v2659_v19 }
  0x1e   : > { %v493_v28 = vrot.slane %v444_v20, 1  ;;  %v494_v29 = vrot.slane %v445_v21, 1  ;;  %v618_v30 = vrot.slane %v569_v22, 2  ;;  %v854_v31 = vmul.f32 %v2645_v12, %v2656_v18  ;;  %p2465_p5 = pnand %p2464_p3, %p2458_p0 }
  0x1f   : > { %v619_v33 = vrot.slane %v570_v25, 2  ;;  %v778_v34 = vrot.slane %v730_v26, 1  ;;  %v779_v35 = vrot.slane %v731_v27, 1  ;;  %v855_v36 = vmul.f32 %v2645_v12, %v2659_v19 }
  0x20   : > { %v495_v37 = vsel %vm492_vm0, %v493_v28, %v494_v29  ;;  %v694_v38 = vmul.f32 %v2649_v15, %v2656_v18  ;;  %v902_v39 = vrot.slane %v854_v31, 2  ;;  %v1014_v40 = vmul.f32 %v2653_v17, %v2675_v32 }
  0x21   : > { %v549_v43 = vadd.f32 %v495_v37, %v408_v24  ;;  %v620_v44 = vsel %vm617_vm1, %v618_v30, %v619_v33  ;;  %v903_v45 = vrot.slane %v855_v36, 2  ;;  %v978_v46 = vmul.f32 %v2651_v16, %v2675_v32 }
  0x22   : > { %v1015_v47 = vmul.f32 %v2653_v17, %v2686_v42  ;;  %v1062_v48 = vrot.slane %v1014_v40, 1  ;;  %v1138_v49 = vmul.f32 %v2664_v23, %v2675_v32  ;;  %v2697_v50 = vmul.f32 %v2664_v23, %v2686_v42 }
  0x23   : > { %v674_v51 = vadd.f32 %v620_v44, %v549_v43  ;;  %v780_v52 = vsel %vm492_vm0, %v778_v34, %v779_v35  ;;  %v409_v53 = vmul.f32 %v2630_v8, %v375_v14  ;;  %v446_v54 = vmul.f32 %v2632_v9, %v376_v41 }
  0x24   : > { %v1063_v55 = vrot.slane %v1015_v47, 1  ;;  %v1186_v56 = vrot.slane %v1138_v49, 2  ;;  %v1187_v57 = vrot.slane %v2697_v50, 2  ;;  %v571_v59 = vmul.f32 %v2634_v10, %v376_v41 }
  0x25   : > { %v710_v60 = vadd.f32 %v694_v38, %v674_v51  ;;  %v904_v61 = vsel %vm617_vm1, %v902_v39, %v903_v45  ;;  %v496_v62 = vrot.slane %v446_v54, 1  ;;  %v732_v63 = vmul.f32 %v2643_v11, %v2704_v58 }
  0x26   : > { %v1064_v0 = vsel %vm492_vm0, %v1062_v48, %v1063_v55  ;;  %v621_v1 = vrot.slane %v571_v59, 2  ;;  %v695_v2 = vmul.f32 %v2649_v15, %v2659_v19  ;;  %v856_v3 = vmul.f32 %v2645_v12, %v2704_v58 }
  0x27   : > { %v834_v4 = vadd.f32 %v780_v52, %v710_v60  ;;  %v1188_v5 = vsel %vm617_vm1, %v1186_v56, %v1187_v57  ;;  %v497_v7 = vsel %vm492_vm0, %v494_v29, %v496_v62  ;;  %v781_v13 = vrot.slane %v732_v63, 1 }
  0x28   : > { %v550_v14 = vadd.f32 %v497_v7, %v409_v53  ;;  %v622_v20 = vsel %vm617_vm1, %v619_v33, %v621_v1  ;;  %v905_v21 = vrot.slane %v856_v3, 2  ;;  %v1016_v22 = vmul.f32 %v2653_v17, %v2717_v6  ;;  %v2772_v3 = vld [vmem:[%s2641_s13 + $0x50] sm:$0xff] }
  0x29   : > { %v958_v24 = vadd.f32 %v904_v61, %v834_v4  ;;  %v782_v25 = vsel %vm492_vm0, %v779_v35, %v781_v13  ;;  %v979_v26 = vmul.f32 %v2651_v16, %v2686_v42  ;;  %v1140_v27 = vmul.f32 %v2664_v23, %v2717_v6  ;;  %v2766_v61 = vld [vmem:[%s2641_s13 + $0x48] sm:$0xff] }
  0x2a   : > { %v675_v28 = vadd.f32 %v622_v20, %v550_v14  ;;  %v1065_v29 = vrot.slane %v1016_v22, 1  ;;  %v410_v30 = vmul.f32 %v2630_v8, %v2656_v18  ;;  %v447_v31 = vmul.f32 %v2632_v9, %v2656_v18 }
  0x2b   : > { %v994_v33 = vadd.f32 %v978_v46, %v958_v24  ;;  %v906_v34 = vsel %vm617_vm1, %v903_v45, %v905_v21  ;;  %v2736_v35 = vmul.f32 %v2632_v9, %v2659_v19  ;;  %v572_v36 = vmul.f32 %v2634_v10, %v2656_v18  ;;  %v2751_v18 = vld [vmem:[%s4085_s3] ss:$0 sm:$0xff] }
  0x2c   : > { %v711_v37 = vadd.f32 %v695_v2, %v675_v28  ;;  %v1189_v38 = vrot.slane %v1140_v27, 2  ;;  %v498_v39 = vrot.slane %v447_v31, 1  ;;  %v2742_v40 = vmul.f32 %v2634_v10, %v2659_v19 }
  0x2d   : > { %v1118_v41 = vadd.f32 %v1064_v0, %v994_v33  ;;  %v1066_v43 = vsel %vm492_vm0, %v1063_v55, %v1065_v29  ;;  %v499_v44 = vrot.slane %v2736_v35, 1  ;;  %v623_v45 = vrot.slane %v572_v36, 2 }
  0x2e   : > { %v835_v46 = vadd.f32 %v782_v25, %v711_v37  ;;  %v624_v47 = vrot.slane %v2742_v40, 2  ;;  %v696_v48 = vmul.f32 %v2649_v15, %v2675_v32  ;;  %v733_v49 = vmul.f32 %v2643_v11, %v2675_v32 }
  0x2f   : > { %v1242_v50 = vadd.f32 %v1188_v5, %v1118_v41  ;;  %v500_v51 = vsel %vm492_vm0, %v498_v39, %v499_v44  ;;  %v734_v52 = vmul.f32 %v2643_v11, %v2686_v42  ;;  %v857_v53 = vmul.f32 %v2645_v12, %v2675_v32  ;;  %v2806_v41 = vld [vmem:[%s2641_s13 + $0x58] sm:$0x3] }
  0x30   : > { %v959_v54 = vadd.f32 %v906_v34, %v835_v46  ;;  %v551_v55 = vadd.f32 %v500_v51, %v410_v30  ;;  %v625_v56 = vsel %vm617_vm1, %v623_v45, %v624_v47  ;;  %v783_v59 = vrot.slane %v733_v49, 1 }
  0x31   : > { %v1264_v60 = vadd.f32 %v2751_v18, %v1242_v50  ;;  %v784_v62 = vrot.slane %v734_v52, 1  ;;  %v858_v63 = vmul.f32 %v2645_v12, %v2686_v42  ;;  %v907_v0 = vrot.slane %v857_v53, 2 }
  0x32   : > { %v995_v1 = vadd.f32 %v979_v26, %v959_v54  ;;  %v1190_v2 = vsel %vm617_vm1, %v1187_v57, %v1189_v38  ;;  %v676_v4 = vadd.f32 %v625_v56, %v551_v55  ;;  %v1017_v5 = vmul.f32 %v2653_v17, %v2766_v61 }
  0x33   : > { %1280 = vst [vmem:[%s2776_s26] sm:$0xff] %v1264_v60  ;;  %v785_v7 = vsel %vm492_vm0, %v783_v59, %v784_v62  ;;  %v908_v13 = vrot.slane %v858_v63, 2  ;;  %v2782_v14 = vmul.f32 %v2653_v17, %v2772_v3  ;;  %v1141_v57 = vmul.f32 %v2664_v23, %v2766_v61 }
  0x34   : > { %v1119_v20 = vadd.f32 %v1066_v43, %v995_v1  ;;  %v712_v21 = vadd.f32 %v696_v48, %v676_v4  ;;  %v1067_v22 = vrot.slane %v1017_v5, 1  ;;  %v2788_v24 = vmul.f32 %v2664_v23, %v2772_v3 }
  0x35   : > { %v909_v25 = vsel %vm617_vm1, %v907_v0, %v908_v13  ;;  %v980_v26 = vmul.f32 %v2651_v16, %v2766_v61  ;;  %v1068_v27 = vrot.slane %v2782_v14, 1  ;;  %v1191_v30 = vrot.slane %v1141_v57, 2 }
  0x36   : > { %v1243_v28 = vadd.f32 %v1190_v2, %v1119_v20  ;;  %v836_v29 = vadd.f32 %v785_v7, %v712_v21  ;;  %v449_v31 = vmul.f32 %v2632_v9, %v2704_v58  ;;  %v1192_v33 = vrot.slane %v2788_v24, 2 }
  0x37   : > { %v411_v34 = vmul.f32 %v2630_v8, %v2659_v19  ;;  %v574_v35 = vmul.f32 %v2634_v10, %v2704_v58  ;;  %v735_v36 = vmul.f32 %v2643_v11, %v2717_v6  ;;  %v1069_v39 = vsel %vm492_vm0, %v1067_v22, %v1068_v27 }
  0x38   : > { %v1265_v37 = vadd.f32 %v2751_v18, %v1243_v28  ;;  %v960_v38 = vadd.f32 %v909_v25, %v836_v29  ;;  %v501_v40 = vrot.slane %v449_v31, 1  ;;  %v697_v45 = vmul.f32 %v2649_v15, %v2686_v42 }
  0x39   : > { %v626_v43 = vrot.slane %v574_v35, 2  ;;  %v786_v46 = vrot.slane %v735_v36, 1  ;;  %v859_v19 = vmul.f32 %v2645_v12, %v2717_v6  ;;  %v1019_v49 = vmul.f32 %v2653_v17, %v2806_v41 }
  0x3a   : > { %1281 = vst [vmem:[%s2776_s26 + $0x8] sm:$0xff] %v1265_v37  ;;  %v996_v58 = vadd.f32 %v980_v26, %v960_v38  ;;  %v502_v48 = vsel %vm492_vm0, %v499_v44, %v501_v40  ;;  %v1143_v50 = vmul.f32 %v2664_v23, %v2806_v41  ;;  %v1193_v51 = vsel %vm617_vm1, %v1191_v30, %v1192_v33  ;;  %v2854_v37 = vld [vmem:[%s2641_s13 + $0x60] sm:$0xff]  ;;  %v2858_v40 = vld [vmem:[%s2641_s13 + $0x68] sm:$0xff] }
  0x3b   : > { %v552_v52 = vadd.f32 %v502_v48, %v411_v34  ;;  %v627_v53 = vsel %vm617_vm1, %v624_v47, %v626_v43  ;;  %v910_v54 = vrot.slane %v859_v19, 2  ;;  %v787_v56 = vsel %vm492_vm0, %v784_v62, %v786_v46 }
  0x3c   : > { %v1120_v55 = vadd.f32 %v1069_v39, %v996_v58  ;;  %v981_v44 = vmul.f32 %v2651_v16, %v2772_v3  ;;  %v1070_v59 = vrot.slane %v1019_v49, 1  ;;  %v1194_v63 = vrot.slane %v1143_v50, 2 }
  0x3d   : > { %v677_v60 = vadd.f32 %v627_v53, %v552_v52  ;;  %v450_v0 = vmul.f32 %v2632_v9, %v2675_v32  ;;  %v2829_v1 = vmul.f32 %v2632_v9, %v2686_v42  ;;  %v911_v47 = vsel %vm617_vm1, %v908_v13, %v910_v54 }
  0x3e   : > { %v1244_v2 = vadd.f32 %v1193_v51, %v1120_v55  ;;  %v412_v62 = vmul.f32 %v2630_v8, %v2675_v32  ;;  %v575_v4 = vmul.f32 %v2634_v10, %v2675_v32  ;;  %v576_v57 = vmul.f32 %v2634_v10, %v2686_v42 }
  0x3f   : > { %v713_v5 = vadd.f32 %v697_v45, %v677_v60  ;;  %v503_v7 = vrot.slane %v450_v0, 1  ;;  %v504_v14 = vrot.slane %v2829_v1, 1  ;;  %v698_v13 = vmul.f32 %v2649_v15, %v2766_v61 }
  0x40   : > { %v1266_v20 = vadd.f32 %v2751_v18, %v1244_v2  ;;  %v628_v21 = vrot.slane %v575_v4, 2  ;;  %v736_v22 = vmul.f32 %v2643_v11, %v2766_v61  ;;  %v629_v26 = vrot.slane %v576_v57, 2  ;;  %v2892_v57 = vld [vmem:[%s2641_s13 + $0x70] sm:$0x3] }
  0x41   : > { %v837_v25 = vadd.f32 %v787_v56, %v713_v5  ;;  %v505_v32 = vsel %vm492_vm0, %v503_v7, %v504_v14  ;;  %v737_v28 = vmul.f32 %v2643_v11, %v2772_v3  ;;  %v860_v31 = vmul.f32 %v2645_v12, %v2766_v61 }
  0x42   : > { %1282 = vst [vmem:[%s2776_s26 + $0x10] sm:$0xff] %v1266_v20  ;;  %v553_v29 = vadd.f32 %v505_v32, %v412_v62  ;;  %v788_v30 = vrot.slane %v736_v22, 1  ;;  %v861_v34 = vmul.f32 %v2645_v12, %v2772_v3  ;;  %v1071_v36 = vsel %vm492_vm0, %v1068_v27, %v1070_v59 }
  0x43   : > { %v961_v35 = vadd.f32 %v911_v47, %v837_v25  ;;  %v630_v38 = vsel %vm617_vm1, %v628_v21, %v629_v26  ;;  %v789_v39 = vrot.slane %v737_v28, 1  ;;  %v912_v45 = vrot.slane %v860_v31, 2 }
  0x44   : > { %v678_v43 = vadd.f32 %v630_v38, %v553_v29  ;;  %v913_v46 = vrot.slane %v861_v34, 2  ;;  %v1020_v19 = vmul.f32 %v2653_v17, %v2854_v37  ;;  %v2865_v49 = vmul.f32 %v2653_v17, %v2858_v40 }
  0x45   : > { %v997_v58 = vadd.f32 %v981_v44, %v961_v35  ;;  %v790_v48 = vsel %vm492_vm0, %v788_v30, %v789_v39  ;;  %v1144_v27 = vmul.f32 %v2664_v23, %v2854_v37  ;;  %v1195_v50 = vsel %vm617_vm1, %v1192_v33, %v1194_v63 }
  0x46   : > { %v714_v51 = vadd.f32 %v698_v13, %v678_v43  ;;  %v1072_v52 = vrot.slane %v1020_v19, 1  ;;  %v2874_v53 = vmul.f32 %v2664_v23, %v2858_v40  ;;  %v914_v55 = vsel %vm617_vm1, %v912_v45, %v913_v46 }
  0x47   : > { %v1121_v54 = vadd.f32 %v1071_v36, %v997_v58  ;;  %v982_v56 = vmul.f32 %v2651_v16, %v2854_v37  ;;  %v1073_v44 = vrot.slane %v2865_v49, 1  ;;  %v1196_v60 = vrot.slane %v1144_v27, 2 }
  0x48   : > { %v838_v59 = vadd.f32 %v790_v48, %v714_v51  ;;  %v452_v24 = vmul.f32 %v2632_v9, %v2717_v6  ;;  %v577_v33 = vmul.f32 %v2634_v10, %v2717_v6  ;;  %v1197_v0 = vrot.slane %v2874_v53, 2 }
  0x49   : > { %v1245_v63 = vadd.f32 %v1195_v50, %v1121_v54  ;;  %v413_v1 = vmul.f32 %v2630_v8, %v2686_v42  ;;  %v738_v2 = vmul.f32 %v2643_v11, %v2806_v41  ;;  %v1074_v62 = vsel %vm492_vm0, %v1072_v52, %v1073_v44 }
  0x4a   : > { %v962_v47 = vadd.f32 %v914_v55, %v838_v59  ;;  %v506_v4 = vrot.slane %v452_v24, 1  ;;  %v631_v5 = vrot.slane %v577_v33, 2  ;;  %v699_v6 = vmul.f32 %v2649_v15, %v2772_v3 }
  0x4b   : > { %v1267_v7 = vadd.f32 %v2751_v18, %v1245_v63  ;;  %v791_v20 = vrot.slane %v738_v2, 1  ;;  %v862_v21 = vmul.f32 %v2645_v12, %v2806_v41  ;;  %v1022_v25 = vmul.f32 %v2653_v17, %v2892_v57 }
  0x4c   : > { %v998_v42 = vadd.f32 %v982_v56, %v962_v47  ;;  %v507_v13 = vsel %vm492_vm0, %v504_v14, %v506_v4  ;;  %v632_v22 = vsel %vm617_vm1, %v629_v26, %v631_v5  ;;  %v1198_v32 = vsel %vm617_vm1, %v1196_v60, %v1197_v0  ;;  %v2940_v47 = vld [vmem:[%s2641_s13 + $0x78] sm:$0xff]  ;;  %v2944_v5 = vld [vmem:[%s2641_s13 + $0x80] sm:$0xff] }
  0x4d   : > { %1283 = vst [vmem:[%s2776_s26 + $0x18] sm:$0xff] %v1267_v7  ;;  %v554_v28 = vadd.f32 %v507_v13, %v413_v1  ;;  %v915_v29 = vrot.slane %v862_v21, 2  ;;  %v1146_v30 = vmul.f32 %v2664_v23, %v2892_v57  ;;  %v792_v34 = vsel %vm492_vm0, %v789_v39, %v791_v20 }
  0x4e   : > { %v1122_v31 = vadd.f32 %v1074_v62, %v998_v42  ;;  %v983_v14 = vmul.f32 %v2651_v16, %v2858_v40  ;;  %v453_v26 = vmul.f32 %v2632_v9, %v2766_v61  ;;  %v1075_v36 = vrot.slane %v1022_v25, 1 }
  0x4f   : > { %v679_v35 = vadd.f32 %v632_v22, %v554_v28  ;;  %v414_v38 = vmul.f32 %v2630_v8, %v2766_v61  ;;  %v2917_v43 = vmul.f32 %v2632_v9, %v2772_v3  ;;  %v916_v19 = vsel %vm617_vm1, %v913_v46, %v915_v29 }
  0x50   : > { %v1246_v45 = vadd.f32 %v1198_v32, %v1122_v31  ;;  %v508_v39 = vrot.slane %v453_v26, 1  ;;  %v578_v58 = vmul.f32 %v2634_v10, %v2766_v61  ;;  %v1199_v49 = vrot.slane %v1146_v30, 2 }
  0x51   : > { %v715_v48 = vadd.f32 %v699_v6, %v679_v35  ;;  %v509_v27 = vrot.slane %v2917_v43, 1  ;;  %v579_v50 = vmul.f32 %v2634_v10, %v2772_v3  ;;  %v700_v54 = vmul.f32 %v2649_v15, %v2854_v37 }
  0x52   : > { %v1268_v51 = vadd.f32 %v2751_v18, %v1246_v45  ;;  %v633_v52 = vrot.slane %v578_v58, 2  ;;  %v739_v46 = vmul.f32 %v2643_v11, %v2854_v37  ;;  %v740_v59 = vmul.f32 %v2643_v11, %v2858_v40 }
  0x53   : > { %v839_v55 = vadd.f32 %v792_v34, %v715_v48  ;;  %v510_v61 = vsel %vm492_vm0, %v508_v39, %v509_v27  ;;  %v634_v56 = vrot.slane %v579_v50, 2  ;;  %v863_v33 = vmul.f32 %v2645_v12, %v2854_v37  ;;  %v2978_v50 = vld [vmem:[%s2641_s13 + $0x88] sm:$0x3] }
  0x54   : > { %1284 = vst [vmem:[%s2776_s26 + $0x20] sm:$0xff] %v1268_v51  ;;  %v555_v60 = vadd.f32 %v510_v61, %v414_v38  ;;  %v793_v24 = vrot.slane %v739_v46, 1  ;;  %v864_v63 = vmul.f32 %v2645_v12, %v2858_v40  ;;  %v1076_v2 = vsel %vm492_vm0, %v1073_v44, %v1075_v36 }
  0x55   : > { %v963_v1 = vadd.f32 %v916_v19, %v839_v55  ;;  %v635_v62 = vsel %vm617_vm1, %v633_v52, %v634_v56  ;;  %v794_v4 = vrot.slane %v740_v59, 1  ;;  %v917_v6 = vrot.slane %v863_v33, 2 }
  0x56   : > { %v680_v7 = vadd.f32 %v635_v62, %v555_v60  ;;  %v918_v20 = vrot.slane %v864_v63, 2  ;;  %v1023_v21 = vmul.f32 %v2653_v17, %v2940_v47  ;;  %v2951_v22 = vmul.f32 %v2653_v17, %v2944_v5 }
  0x57   : > { %v999_v42 = vadd.f32 %v983_v14, %v963_v1  ;;  %v795_v13 = vsel %vm492_vm0, %v793_v24, %v794_v4  ;;  %v1147_v44 = vmul.f32 %v2664_v23, %v2940_v47  ;;  %v1200_v25 = vsel %vm617_vm1, %v1197_v0, %v1199_v49 }
  0x58   : > { %v716_v32 = vadd.f32 %v700_v54, %v680_v7  ;;  %v1077_v28 = vrot.slane %v1023_v21, 1  ;;  %v2960_v29 = vmul.f32 %v2664_v23, %v2944_v5  ;;  %v919_v31 = vsel %vm617_vm1, %v917_v6, %v918_v20 }
  0x59   : > { %v1123_v30 = vadd.f32 %v1076_v2, %v999_v42  ;;  %v984_v34 = vmul.f32 %v2651_v16, %v2940_v47  ;;  %v1078_v14 = vrot.slane %v2951_v22, 1  ;;  %v1201_v35 = vrot.slane %v1147_v44, 2 }
  0x5a   : > { %v840_v26 = vadd.f32 %v795_v13, %v716_v32  ;;  %v455_v53 = vmul.f32 %v2632_v9, %v2806_v41  ;;  %v580_v0 = vmul.f32 %v2634_v10, %v2806_v41  ;;  %v1202_v38 = vrot.slane %v2960_v29, 2 }
  0x5b   : > { %v1247_v36 = vadd.f32 %v1200_v25, %v1123_v30  ;;  %v415_v43 = vmul.f32 %v2630_v8, %v2772_v3  ;;  %v741_v45 = vmul.f32 %v2643_v11, %v2892_v57  ;;  %v1079_v39 = vsel %vm492_vm0, %v1077_v28, %v1078_v14 }
  0x5c   : > { %v964_v19 = vadd.f32 %v919_v31, %v840_v26  ;;  %v511_v58 = vrot.slane %v455_v53, 1  ;;  %v636_v48 = vrot.slane %v580_v0, 2  ;;  %v701_v41 = vmul.f32 %v2649_v15, %v2858_v40 }
  0x5d   : > { %v1269_v49 = vadd.f32 %v2751_v18, %v1247_v36  ;;  %v796_v51 = vrot.slane %v741_v45, 1  ;;  %v865_v52 = vmul.f32 %v2645_v12, %v2892_v57  ;;  %v1025_v55 = vmul.f32 %v2653_v17, %v2978_v50 }
  0x5e   : > { %v1000_v3 = vadd.f32 %v984_v34, %v964_v19  ;;  %v512_v54 = vsel %vm492_vm0, %v509_v27, %v511_v58  ;;  %v637_v46 = vsel %vm617_vm1, %v634_v56, %v636_v48  ;;  %v1203_v61 = vsel %vm617_vm1, %v1201_v35, %v1202_v38  ;;  %v3026_v19 = vld [vmem:[%s2641_s13 + $0x90] sm:$0xff]  ;;  %v3030_v48 = vld [vmem:[%s2641_s13 + $0x98] sm:$0xff] }
  0x5f   : > { %1285 = vst [vmem:[%s2776_s26 + $0x28] sm:$0xff] %v1269_v49  ;;  %v556_v59 = vadd.f32 %v512_v54, %v415_v43  ;;  %v920_v60 = vrot.slane %v865_v52, 2  ;;  %v1149_v24 = vmul.f32 %v2664_v23, %v2978_v50  ;;  %v797_v63 = vsel %vm492_vm0, %v794_v4, %v796_v51 }
  0x60   : > { %v1124_v33 = vadd.f32 %v1079_v39, %v1000_v3  ;;  %v985_v27 = vmul.f32 %v2651_v16, %v2944_v5  ;;  %v456_v56 = vmul.f32 %v2632_v9, %v2854_v37  ;;  %v1080_v2 = vrot.slane %v1025_v55, 1 }
  0x61   : > { %v681_v1 = vadd.f32 %v637_v46, %v556_v59  ;;  %v416_v62 = vmul.f32 %v2630_v8, %v2854_v37  ;;  %v3003_v7 = vmul.f32 %v2632_v9, %v2858_v40  ;;  %v921_v21 = vsel %vm617_vm1, %v918_v20, %v920_v60 }
  0x62   : > { %v1248_v6 = vadd.f32 %v1203_v61, %v1124_v33  ;;  %v513_v4 = vrot.slane %v456_v56, 1  ;;  %v581_v42 = vmul.f32 %v2634_v10, %v2854_v37  ;;  %v1204_v22 = vrot.slane %v1149_v24, 2 }
  0x63   : > { %v717_v13 = vadd.f32 %v701_v41, %v681_v1  ;;  %v514_v44 = vrot.slane %v3003_v7, 1  ;;  %v582_v25 = vmul.f32 %v2634_v10, %v2858_v40  ;;  %v702_v30 = vmul.f32 %v2649_v15, %v2940_v47 }
  0x64   : > { %v1270_v32 = vadd.f32 %v2751_v18, %v1248_v6  ;;  %v638_v28 = vrot.slane %v581_v42, 2  ;;  %v742_v20 = vmul.f32 %v2643_v11, %v2940_v47  ;;  %v743_v26 = vmul.f32 %v2643_v11, %v2944_v5 }
  0x65   : > { %v841_v31 = vadd.f32 %v797_v63, %v717_v13  ;;  %v515_v37 = vsel %vm492_vm0, %v513_v4, %v514_v44  ;;  %v639_v34 = vrot.slane %v582_v25, 2  ;;  %v866_v0 = vmul.f32 %v2645_v12, %v2940_v47  ;;  %v3064_v25 = vld [vmem:[%s2641_s13 + $0xa0] sm:$0x3] }
  0x66   : > { %1286 = vst [vmem:[%s2776_s26 + $0x30] sm:$0xff] %v1270_v32  ;;  %v557_v35 = vadd.f32 %v515_v37, %v416_v62  ;;  %v798_v53 = vrot.slane %v742_v20, 1  ;;  %v867_v36 = vmul.f32 %v2645_v12, %v2944_v5  ;;  %v1081_v45 = vsel %vm492_vm0, %v1078_v14, %v1080_v2 }
  0x67   : > { %v965_v43 = vadd.f32 %v921_v21, %v841_v31  ;;  %v640_v39 = vsel %vm617_vm1, %v638_v28, %v639_v34  ;;  %v799_v58 = vrot.slane %v743_v26, 1  ;;  %v922_v41 = vrot.slane %v866_v0, 2 }
  0x68   : > { %v682_v49 = vadd.f32 %v640_v39, %v557_v35  ;;  %v923_v51 = vrot.slane %v867_v36, 2  ;;  %v1026_v52 = vmul.f32 %v2653_v17, %v3026_v19  ;;  %v3037_v46 = vmul.f32 %v2653_v17, %v3030_v48 }
  0x69   : > { %v1001_v3 = vadd.f32 %v985_v27, %v965_v43  ;;  %v800_v54 = vsel %vm492_vm0, %v798_v53, %v799_v58  ;;  %v1150_v14 = vmul.f32 %v2664_v23, %v3026_v19  ;;  %v1205_v55 = vsel %vm617_vm1, %v1202_v38, %v1204_v22 }
  0x6a   : > { %v718_v61 = vadd.f32 %v702_v30, %v682_v49  ;;  %v1082_v59 = vrot.slane %v1026_v52, 1  ;;  %v3046_v60 = vmul.f32 %v2664_v23, %v3030_v48  ;;  %v924_v33 = vsel %vm617_vm1, %v922_v41, %v923_v51 }
  0x6b   : > { %v1125_v24 = vadd.f32 %v1081_v45, %v1001_v3  ;;  %v986_v63 = vmul.f32 %v2651_v16, %v3026_v19  ;;  %v1083_v27 = vrot.slane %v3037_v46, 1  ;;  %v1206_v1 = vrot.slane %v1150_v14, 2 }
  0x6c   : > { %v842_v56 = vadd.f32 %v800_v54, %v718_v61  ;;  %v458_v29 = vmul.f32 %v2632_v9, %v2892_v57  ;;  %v583_v38 = vmul.f32 %v2634_v10, %v2892_v57  ;;  %v1207_v62 = vrot.slane %v3046_v60, 2 }
  0x6d   : > { %v1249_v2 = vadd.f32 %v1205_v55, %v1125_v24  ;;  %v417_v7 = vmul.f32 %v2630_v8, %v2858_v40  ;;  %v744_v6 = vmul.f32 %v2643_v11, %v2978_v50  ;;  %v1084_v4 = vsel %vm492_vm0, %v1082_v59, %v1083_v27 }
  0x6e   : > { %v966_v21 = vadd.f32 %v924_v33, %v842_v56  ;;  %v516_v42 = vrot.slane %v458_v29, 1  ;;  %v641_v13 = vrot.slane %v583_v38, 2  ;;  %v703_v57 = vmul.f32 %v2649_v15, %v2944_v5 }
  0x6f   : > { %v1271_v22 = vadd.f32 %v2751_v18, %v1249_v2  ;;  %v801_v32 = vrot.slane %v744_v6, 1  ;;  %v868_v28 = vmul.f32 %v2645_v12, %v2978_v50  ;;  %v1028_v31 = vmul.f32 %v2653_v17, %v3064_v25 }
  0x70   : > { %v1002_v40 = vadd.f32 %v986_v63, %v966_v21  ;;  %v517_v30 = vsel %vm492_vm0, %v514_v44, %v516_v42  ;;  %v642_v20 = vsel %vm617_vm1, %v639_v34, %v641_v13  ;;  %v1208_v37 = vsel %vm617_vm1, %v1206_v1, %v1207_v62  ;;  %v3112_v21 = vld [vmem:[%s2641_s13 + $0xa8] sm:$0xff]  ;;  %v3116_v13 = vld [vmem:[%s2641_s13 + $0xb0] sm:$0xff] }
  0x71   : > { %1287 = vst [vmem:[%s2776_s26 + $0x38] sm:$0xff] %v1271_v22  ;;  %v558_v26 = vadd.f32 %v517_v30, %v417_v7  ;;  %v925_v35 = vrot.slane %v868_v28, 2  ;;  %v1152_v53 = vmul.f32 %v2664_v23, %v3064_v25  ;;  %v802_v36 = vsel %vm492_vm0, %v799_v58, %v801_v32 }
  0x72   : > { %v1126_v0 = vadd.f32 %v1084_v4, %v1002_v40  ;;  %v987_v44 = vmul.f32 %v2651_v16, %v3030_v48  ;;  %v459_v34 = vmul.f32 %v2632_v9, %v2940_v47  ;;  %v1085_v45 = vrot.slane %v1028_v31, 1 }
  0x73   : > { %v683_v43 = vadd.f32 %v642_v20, %v558_v26  ;;  %v418_v39 = vmul.f32 %v2630_v8, %v2940_v47  ;;  %v3089_v49 = vmul.f32 %v2632_v9, %v2944_v5  ;;  %v926_v52 = vsel %vm617_vm1, %v923_v51, %v925_v35 }
  0x74   : > { %v1250_v41 = vadd.f32 %v1208_v37, %v1126_v0  ;;  %v518_v58 = vrot.slane %v459_v34, 1  ;;  %v584_v3 = vmul.f32 %v2634_v10, %v2940_v47  ;;  %v1209_v46 = vrot.slane %v1152_v53, 2 }
  0x75   : > { %v719_v54 = vadd.f32 %v703_v57, %v683_v43  ;;  %v519_v14 = vrot.slane %v3089_v49, 1  ;;  %v585_v55 = vmul.f32 %v2634_v10, %v2944_v5  ;;  %v704_v24 = vmul.f32 %v2649_v15, %v3026_v19 }
  0x76   : > { %v1272_v61 = vadd.f32 %v2751_v18, %v1250_v41  ;;  %v643_v59 = vrot.slane %v584_v3, 2  ;;  %v745_v51 = vmul.f32 %v2643_v11, %v3026_v19  ;;  %v746_v56 = vmul.f32 %v2643_v11, %v3030_v48 }
  0x77   : > { %v843_v33 = vadd.f32 %v802_v36, %v719_v54  ;;  %v520_v47 = vsel %vm492_vm0, %v518_v58, %v519_v14  ;;  %v644_v63 = vrot.slane %v585_v55, 2  ;;  %v869_v38 = vmul.f32 %v2645_v12, %v3026_v19  ;;  %v3150_v55 = vld [vmem:[%s2641_s13 + $0xb8] sm:$0x3] }
  0x78   : > { %1288 = vst [vmem:[%s2776_s26 + $0x40] sm:$0xff] %v1272_v61  ;;  %v559_v1 = vadd.f32 %v520_v47, %v418_v39  ;;  %v803_v29 = vrot.slane %v745_v51, 1  ;;  %v870_v2 = vmul.f32 %v2645_v12, %v3030_v48  ;;  %v1086_v6 = vsel %vm492_vm0, %v1083_v27, %v1085_v45 }
  0x79   : > { %v967_v7 = vadd.f32 %v926_v52, %v843_v33  ;;  %v645_v4 = vsel %vm617_vm1, %v643_v59, %v644_v63  ;;  %v804_v42 = vrot.slane %v746_v56, 1  ;;  %v927_v57 = vrot.slane %v869_v38, 2 }
  0x7a   : > { %v684_v22 = vadd.f32 %v645_v4, %v559_v1  ;;  %v928_v32 = vrot.slane %v870_v2, 2  ;;  %v1029_v28 = vmul.f32 %v2653_v17, %v3112_v21  ;;  %v3123_v20 = vmul.f32 %v2653_v17, %v3116_v13 }
  0x7b   : > { %v1003_v40 = vadd.f32 %v987_v44, %v967_v7  ;;  %v805_v30 = vsel %vm492_vm0, %v803_v29, %v804_v42  ;;  %v1153_v27 = vmul.f32 %v2664_v23, %v3112_v21  ;;  %v1210_v31 = vsel %vm617_vm1, %v1207_v62, %v1209_v46 }
  0x7c   : > { %v720_v37 = vadd.f32 %v704_v24, %v684_v22  ;;  %v1087_v26 = vrot.slane %v1029_v28, 1  ;;  %v3132_v35 = vmul.f32 %v2664_v23, %v3116_v13  ;;  %v929_v0 = vsel %vm617_vm1, %v927_v57, %v928_v32 }
  0x7d   : > { %v1127_v53 = vadd.f32 %v1086_v6, %v1003_v40  ;;  %v988_v36 = vmul.f32 %v2651_v16, %v3112_v21  ;;  %v1088_v44 = vrot.slane %v3123_v20, 1  ;;  %v1211_v43 = vrot.slane %v1153_v27, 2 }
  0x7e   : > { %v844_v34 = vadd.f32 %v805_v30, %v720_v37  ;;  %v461_v60 = vmul.f32 %v2632_v9, %v2978_v50  ;;  %v586_v62 = vmul.f32 %v2634_v10, %v2978_v50  ;;  %v1212_v39 = vrot.slane %v3132_v35, 2 }
  0x7f   : > { %v1251_v45 = vadd.f32 %v1210_v31, %v1127_v53  ;;  %v419_v49 = vmul.f32 %v2630_v8, %v2944_v5  ;;  %v747_v41 = vmul.f32 %v2643_v11, %v3064_v25  ;;  %v1089_v58 = vsel %vm492_vm0, %v1087_v26, %v1088_v44 }
  0x80   : > { %v968_v52 = vadd.f32 %v929_v0, %v844_v34  ;;  %v521_v3 = vrot.slane %v461_v60, 1  ;;  %v646_v54 = vrot.slane %v586_v62, 2  ;;  %v705_v50 = vmul.f32 %v2649_v15, %v3030_v48 }
  0x81   : > { %v1273_v46 = vadd.f32 %v2751_v18, %v1251_v45  ;;  %v806_v61 = vrot.slane %v747_v41, 1  ;;  %v871_v59 = vmul.f32 %v2645_v12, %v3064_v25  ;;  %v1031_v33 = vmul.f32 %v2653_v17, %v3150_v55 }
  0x82   : > { %v1004_v5 = vadd.f32 %v988_v36, %v968_v52  ;;  %v522_v24 = vsel %vm492_vm0, %v519_v14, %v521_v3  ;;  %v647_v51 = vsel %vm617_vm1, %v644_v63, %v646_v54  ;;  %v1213_v47 = vsel %vm617_vm1, %v1211_v43, %v1212_v39  ;;  %v3198_v52 = vld [vmem:[%s2641_s13 + $0xc0] sm:$0xff]  ;;  %v3202_v54 = vld [vmem:[%s2641_s13 + $0xc8] sm:$0xff] }
  0x83   : > { %1289 = vst [vmem:[%s2776_s26 + $0x48] sm:$0xff] %v1273_v46  ;;  %v560_v56 = vadd.f32 %v522_v24, %v419_v49  ;;  %v930_v1 = vrot.slane %v871_v59, 2  ;;  %v1155_v29 = vmul.f32 %v2664_v23, %v3150_v55  ;;  %v807_v2 = vsel %vm492_vm0, %v804_v42, %v806_v61 }
  0x84   : > { %v1128_v38 = vadd.f32 %v1089_v58, %v1004_v5  ;;  %v989_v14 = vmul.f32 %v2651_v16, %v3116_v13  ;;  %v462_v63 = vmul.f32 %v2632_v9, %v3026_v19  ;;  %v1090_v6 = vrot.slane %v1031_v33, 1 }
  0x85   : > { %v685_v7 = vadd.f32 %v647_v51, %v560_v56  ;;  %v420_v4 = vmul.f32 %v2630_v8, %v3026_v19  ;;  %v3175_v22 = vmul.f32 %v2632_v9, %v3030_v48  ;;  %v931_v28 = vsel %vm617_vm1, %v928_v32, %v930_v1 }
  0x86   : > { %v1252_v57 = vadd.f32 %v1213_v47, %v1128_v38  ;;  %v523_v42 = vrot.slane %v462_v63, 1  ;;  %v587_v40 = vmul.f32 %v2634_v10, %v3026_v19  ;;  %v1214_v20 = vrot.slane %v1155_v29, 2 }
  0x87   : > { %v721_v30 = vadd.f32 %v705_v50, %v685_v7  ;;  %v524_v27 = vrot.slane %v3175_v22, 1  ;;  %v588_v31 = vmul.f32 %v2634_v10, %v3030_v48  ;;  %v706_v53 = vmul.f32 %v2649_v15, %v3112_v21 }
  0x88   : > { %v1274_v37 = vadd.f32 %v2751_v18, %v1252_v57  ;;  %v648_v26 = vrot.slane %v587_v40, 2  ;;  %v748_v32 = vmul.f32 %v2643_v11, %v3112_v21  ;;  %v749_v34 = vmul.f32 %v2643_v11, %v3116_v13 }
  0x89   : > { %v845_v0 = vadd.f32 %v807_v2, %v721_v30  ;;  %v525_v19 = vsel %vm492_vm0, %v523_v42, %v524_v27  ;;  %v649_v36 = vrot.slane %v588_v31, 2  ;;  %v872_v62 = vmul.f32 %v2645_v12, %v3112_v21  ;;  %v3236_v31 = vld [vmem:[%s2641_s13 + $0xd0] sm:$0x3] }
  0x8a   : > { %1290 = vst [vmem:[%s2776_s26 + $0x50] sm:$0xff] %v1274_v37  ;;  %v561_v43 = vadd.f32 %v525_v19, %v420_v4  ;;  %v808_v60 = vrot.slane %v748_v32, 1  ;;  %v873_v45 = vmul.f32 %v2645_v12, %v3116_v13  ;;  %v1091_v41 = vsel %vm492_vm0, %v1088_v44, %v1090_v6 }
  0x8b   : > { %v969_v49 = vadd.f32 %v931_v28, %v845_v0  ;;  %v650_v58 = vsel %vm617_vm1, %v648_v26, %v649_v36  ;;  %v809_v3 = vrot.slane %v749_v34, 1  ;;  %v932_v50 = vrot.slane %v872_v62, 2 }
  0x8c   : > { %v686_v46 = vadd.f32 %v650_v58, %v561_v43  ;;  %v933_v61 = vrot.slane %v873_v45, 2  ;;  %v1032_v59 = vmul.f32 %v2653_v17, %v3198_v52  ;;  %v3209_v51 = vmul.f32 %v2653_v17, %v3202_v54 }
  0x8d   : > { %v1005_v5 = vadd.f32 %v989_v14, %v969_v49  ;;  %v810_v24 = vsel %vm492_vm0, %v808_v60, %v809_v3  ;;  %v1156_v44 = vmul.f32 %v2664_v23, %v3198_v52  ;;  %v1215_v33 = vsel %vm617_vm1, %v1212_v39, %v1214_v20 }
  0x8e   : > { %v722_v47 = vadd.f32 %v706_v53, %v686_v46  ;;  %v1092_v56 = vrot.slane %v1032_v59, 1  ;;  %v3218_v1 = vmul.f32 %v2664_v23, %v3202_v54  ;;  %v934_v38 = vsel %vm617_vm1, %v932_v50, %v933_v61 }
  0x8f   : > { %v1129_v29 = vadd.f32 %v1091_v41, %v1005_v5  ;;  %v990_v2 = vmul.f32 %v2651_v16, %v3198_v52  ;;  %v1093_v14 = vrot.slane %v3209_v51, 1  ;;  %v1216_v7 = vrot.slane %v1156_v44, 2 }
  0x90   : > { %v846_v63 = vadd.f32 %v810_v24, %v722_v47  ;;  %v464_v35 = vmul.f32 %v2632_v9, %v3064_v25  ;;  %v589_v39 = vmul.f32 %v2634_v10, %v3064_v25  ;;  %v1217_v4 = vrot.slane %v3218_v1, 2 }
  0x91   : > { %v1253_v6 = vadd.f32 %v1215_v33, %v1129_v29  ;;  %v421_v22 = vmul.f32 %v2630_v8, %v3030_v48  ;;  %v750_v57 = vmul.f32 %v2643_v11, %v3150_v55  ;;  %v1094_v42 = vsel %vm492_vm0, %v1092_v56, %v1093_v14 }
  0x92   : > { %v970_v28 = vadd.f32 %v934_v38, %v846_v63  ;;  %v526_v40 = vrot.slane %v464_v35, 1  ;;  %v651_v30 = vrot.slane %v589_v39, 2  ;;  %v707_v25 = vmul.f32 %v2649_v15, %v3116_v13 }
  0x93   : > { %v1275_v20 = vadd.f32 %v2751_v18, %v1253_v6  ;;  %v811_v37 = vrot.slane %v750_v57, 1  ;;  %v874_v26 = vmul.f32 %v2645_v12, %v3150_v55  ;;  %v1034_v0 = vmul.f32 %v2653_v17, %v3236_v31 }
  0x94   : > { %v1006_v48 = vadd.f32 %v990_v2, %v970_v28  ;;  %v527_v53 = vsel %vm492_vm0, %v524_v27, %v526_v40  ;;  %v652_v32 = vsel %vm617_vm1, %v649_v36, %v651_v30  ;;  %v1218_v19 = vsel %vm617_vm1, %v1216_v7, %v1217_v4  ;;  %v3284_v28 = vld [vmem:[%s2641_s13 + $0xd8] sm:$0xff]  ;;  %v3288_v30 = vld [vmem:[%s2641_s13 + $0xe0] sm:$0xff] }
  0x95   : > { %1291 = vst [vmem:[%s2776_s26 + $0x58] sm:$0xff] %v1275_v20  ;;  %v562_v34 = vadd.f32 %v527_v53, %v421_v22  ;;  %v935_v43 = vrot.slane %v874_v26, 2  ;;  %v1158_v60 = vmul.f32 %v2664_v23, %v3236_v31  ;;  %v812_v45 = vsel %vm492_vm0, %v809_v3, %v811_v37 }
  0x96   : > { %v1130_v62 = vadd.f32 %v1094_v42, %v1006_v48  ;;  %v991_v27 = vmul.f32 %v2651_v16, %v3202_v54  ;;  %v465_v36 = vmul.f32 %v2632_v9, %v3112_v21  ;;  %v1095_v41 = vrot.slane %v1034_v0, 1 }
  0x97   : > { %v687_v49 = vadd.f32 %v652_v32, %v562_v34  ;;  %v422_v58 = vmul.f32 %v2630_v8, %v3112_v21  ;;  %v3261_v46 = vmul.f32 %v2632_v9, %v3116_v13  ;;  %v936_v59 = vsel %vm617_vm1, %v933_v61, %v935_v43 }
  0x98   : > { %v1254_v50 = vadd.f32 %v1218_v19, %v1130_v62  ;;  %v528_v3 = vrot.slane %v465_v36, 1  ;;  %v590_v5 = vmul.f32 %v2634_v10, %v3112_v21  ;;  %v1219_v51 = vrot.slane %v1158_v60, 2 }
  0x99   : > { %v723_v24 = vadd.f32 %v707_v25, %v687_v49  ;;  %v529_v44 = vrot.slane %v3261_v46, 1  ;;  %v591_v33 = vmul.f32 %v2634_v10, %v3116_v13  ;;  %v708_v29 = vmul.f32 %v2649_v15, %v3198_v52  ;;  %v403_v46 = vld [vmem:[%s2641_s13 + $0xe8] sm:$0x3] }
  0x9a   : > { %v1276_v47 = vadd.f32 %v2751_v18, %v1254_v50  ;;  %v653_v56 = vrot.slane %v590_v5, 2  ;;  %v751_v61 = vmul.f32 %v2643_v11, %v3198_v52  ;;  %v752_v63 = vmul.f32 %v2643_v11, %v3202_v54 }
  0x9b   : > { %v847_v38 = vadd.f32 %v812_v45, %v723_v24  ;;  %v530_v21 = vsel %vm492_vm0, %v528_v3, %v529_v44  ;;  %v654_v2 = vrot.slane %v591_v33, 2  ;;  %v875_v39 = vmul.f32 %v2645_v12, %v3198_v52 }
  0x9c   : > { %1292 = vst [vmem:[%s2776_s26 + $0x60] sm:$0xff] %v1276_v47  ;;  %v563_v7 = vadd.f32 %v530_v21, %v422_v58  ;;  %v813_v35 = vrot.slane %v751_v61, 1  ;;  %v876_v6 = vmul.f32 %v2645_v12, %v3202_v54  ;;  %v1096_v57 = vsel %vm492_vm0, %v1093_v14, %v1095_v41 }
  0x9d   : > { %v971_v22 = vadd.f32 %v936_v59, %v847_v38  ;;  %v655_v42 = vsel %vm617_vm1, %v653_v56, %v654_v2  ;;  %v814_v40 = vrot.slane %v752_v63, 1  ;;  %v937_v25 = vrot.slane %v875_v39, 2 }
  0x9e   : > { %v688_v20 = vadd.f32 %v655_v42, %v563_v7  ;;  %v938_v37 = vrot.slane %v876_v6, 2  ;;  %v1035_v26 = vmul.f32 %v2653_v17, %v3284_v28  ;;  %v3295_v32 = vmul.f32 %v2653_v17, %v3288_v30 }
  0x9f   : > { %v1007_v48 = vadd.f32 %v991_v27, %v971_v22  ;;  %v815_v53 = vsel %vm492_vm0, %v813_v35, %v814_v40  ;;  %v1159_v14 = vmul.f32 %v2664_v23, %v3284_v28  ;;  %v1220_v0 = vsel %vm617_vm1, %v1217_v4, %v1219_v51 }
  0xa0   : > { %v724_v19 = vadd.f32 %v708_v29, %v688_v20  ;;  %v1097_v34 = vrot.slane %v1035_v26, 1  ;;  %v3304_v43 = vmul.f32 %v2664_v23, %v3288_v30  ;;  %v939_v62 = vsel %vm617_vm1, %v937_v25, %v938_v37 }
  0xa1   : > { %v1131_v60 = vadd.f32 %v1096_v57, %v1007_v48  ;;  %v992_v45 = vmul.f32 %v2651_v16, %v3284_v28  ;;  %v1098_v27 = vrot.slane %v3295_v32, 1  ;;  %v1221_v49 = vrot.slane %v1159_v14, 2  ;;  %v3354_v14 = vld [vmem:[%s4085_s3] ss:$0 sm:$0xff] }
  0xa2   : > { %v848_v36 = vadd.f32 %v815_v53, %v724_v19  ;;  %v467_v1 = vmul.f32 %v2632_v9, %v3150_v55  ;;  %v592_v4 = vmul.f32 %v2634_v10, %v3150_v55  ;;  %v1222_v58 = vrot.slane %v3304_v43, 2  ;;  %v3399_v43 = vld [vmem:[%s2641_s13 + $0xe8] sm:$0x3] }
  0xa3   : > { %v1255_v41 = vadd.f32 %v1220_v0, %v1131_v60  ;;  %v423_v50 = vmul.f32 %v2630_v8, %v3116_v13  ;;  %v753_v59 = vmul.f32 %v2643_v11, %v3236_v31  ;;  %v1099_v5 = vsel %vm492_vm0, %v1097_v34, %v1098_v27 }
  0xa4   : > { %v972_v3 = vadd.f32 %v939_v62, %v848_v36  ;;  %v531_v24 = vrot.slane %v467_v1, 1  ;;  %v656_v51 = vrot.slane %v592_v4, 2  ;;  %v709_v55 = vmul.f32 %v2649_v15, %v3202_v54 }
  0xa5   : > { %v1277_v33 = vadd.f32 %v2751_v18, %v1255_v41  ;;  %v816_v47 = vrot.slane %v753_v59, 1  ;;  %v877_v56 = vmul.f32 %v2645_v12, %v3236_v31  ;;  %v1037_v38 = vmul.f32 %v2653_v17, %v403_v46 }
  0xa6   : > { %v1008_v29 = vadd.f32 %v992_v45, %v972_v3  ;;  %v532_v13 = vsel %vm492_vm0, %v529_v44, %v531_v24  ;;  %v657_v61 = vsel %vm617_vm1, %v654_v2, %v656_v51  ;;  %v1223_v21 = vsel %vm617_vm1, %v1221_v49, %v1222_v58 }
  0xa7   : > { %1293 = vst [vmem:[%s2776_s26 + $0x68] sm:$0xff] %v1277_v33  ;;  %v564_v18 = vadd.f32 %v532_v13, %v423_v50  ;;  %v940_v63 = vrot.slane %v877_v56, 2  ;;  %v1161_v7 = vmul.f32 %v2664_v23, %v403_v46  ;;  %v817_v39 = vsel %vm492_vm0, %v814_v40, %v816_v47  ;;  %v3371_v50 = vld [vmem:[%s2641_s13 + $0xf0] sm:$0xff] }
  0xa8   : > { %v1132_v35 = vadd.f32 %v1099_v5, %v1008_v29  ;;  %v993_v31 = vmul.f32 %v2651_v16, %v3288_v30  ;;  %v1359_v44 = vmul.f32 %v2632_v9, %v3198_v52  ;;  %v1100_v6 = vrot.slane %v1037_v38, 1  ;;  %v3375_v5 = vld [vmem:[%s2641_s13 + $0xf8] sm:$0xff]  ;;  %v2347_v13 = vld [vmem:[%s2641_s13 + $0xd0] sm:$0x3] }
  0xa9   : > { %v689_v2 = vadd.f32 %v657_v61, %v564_v18  ;;  %v1327_v22 = vmul.f32 %v2630_v8, %v3198_v52  ;;  %v3343_v57 = vmul.f32 %v2632_v9, %v3202_v54  ;;  %v941_v20 = vsel %vm617_vm1, %v938_v37, %v940_v63 }
  0xaa   : > { %v1256_v42 = vadd.f32 %v1223_v21, %v1132_v35  ;;  %v1407_v40 = vrot.slane %v1359_v44, 1  ;;  %v1479_v25 = vmul.f32 %v2634_v10, %v3198_v52  ;;  %v1224_v48 = vrot.slane %v1161_v7, 2 }
  0xab   : > { %v725_v26 = vadd.f32 %v709_v55, %v689_v2  ;;  %v1408_v53 = vrot.slane %v3343_v57, 1  ;;  %v1480_v32 = vmul.f32 %v2634_v10, %v3202_v54  ;;  %v1599_v19 = vmul.f32 %v2649_v15, %v3284_v28 }
  0xac   : > { %v1278_v37 = vadd.f32 %v3354_v14, %v1256_v42  ;;  %v1527_v0 = vrot.slane %v1479_v25, 2  ;;  %v1631_v52 = vmul.f32 %v2643_v11, %v3284_v28  ;;  %v1632_v45 = vmul.f32 %v2643_v11, %v3288_v30 }
  0xad   : > { %v849_v34 = vadd.f32 %v817_v39, %v725_v26  ;;  %v1409_v60 = vsel %vm492_vm0, %v1407_v40, %v1408_v53  ;;  %v1528_v62 = vrot.slane %v1480_v32, 2  ;;  %v1751_v1 = vmul.f32 %v2645_v12, %v3284_v28  ;;  %v3411_v32 = vld [vmem:[%s2641_s13 + $0x100] sm:$0x3] }
  0xae   : > { %1294 = vst [vmem:[%s2776_s26 + $0x70] sm:$0xff] %v1278_v37  ;;  %v1463_v36 = vadd.f32 %v1409_v60, %v1327_v22  ;;  %v1679_v49 = vrot.slane %v1631_v52, 1  ;;  %v1752_v4 = vmul.f32 %v2645_v12, %v3288_v30  ;;  %v1101_v46 = vsel %vm492_vm0, %v1098_v27, %v1100_v6 }
  0xaf   : > { %v973_v41 = vadd.f32 %v941_v20, %v849_v34  ;;  %v1529_v59 = vsel %vm617_vm1, %v1527_v0, %v1528_v62  ;;  %v1680_v3 = vrot.slane %v1632_v45, 1  ;;  %v1799_v51 = vrot.slane %v1751_v1, 2 }
  0xb0   : > { %v1583_v24 = vadd.f32 %v1529_v59, %v1463_v36  ;;  %v1800_v33 = vrot.slane %v1752_v4, 2  ;;  %v1903_v55 = vmul.f32 %v3371_v50, %v2653_v17  ;;  %v3382_v27 = vmul.f32 %v3375_v5, %v2653_v17 }
  0xb1   : > { %v1009_v47 = vadd.f32 %v993_v31, %v973_v41  ;;  %v1681_v56 = vsel %vm492_vm0, %v1679_v49, %v1680_v3  ;;  %v2023_v29 = vmul.f32 %v3371_v50, %v2664_v23  ;;  %v1225_v61 = vsel %vm617_vm1, %v1222_v58, %v1224_v48 }
  0xb2   : > { %v1615_v38 = vadd.f32 %v1599_v19, %v1583_v24  ;;  %v1951_v21 = vrot.slane %v1903_v55, 1  ;;  %v3392_v18 = vmul.f32 %v3375_v5, %v2664_v23  ;;  %v1801_v7 = vsel %vm617_vm1, %v1799_v51, %v1800_v33 }
  0xb3   : > { %v1133_v63 = vadd.f32 %v1101_v46, %v1009_v47  ;;  %v1871_v35 = vmul.f32 %v3371_v50, %v2651_v16  ;;  %v1952_v39 = vrot.slane %v3382_v27, 1  ;;  %v2071_v44 = vrot.slane %v2023_v29, 2 }
  0xb4   : > { %v1735_v31 = vadd.f32 %v1681_v56, %v1615_v38  ;;  %v1361_v58 = vmul.f32 %v2347_v13, %v2632_v9  ;;  %v1481_v2 = vmul.f32 %v2347_v13, %v2634_v10  ;;  %v2072_v22 = vrot.slane %v3392_v18, 2 }
  0xb5   : > { %v1257_v6 = vadd.f32 %v1225_v61, %v1133_v63  ;;  %v1328_v57 = vmul.f32 %v2630_v8, %v3202_v54  ;;  %v1633_v42 = vmul.f32 %v3399_v43, %v2643_v11  ;;  %v1953_v40 = vsel %vm492_vm0, %v1951_v21, %v1952_v39 }
  0xb6   : > { %v1855_v20 = vadd.f32 %v1801_v7, %v1735_v31  ;;  %v1410_v25 = vrot.slane %v1361_v58, 1  ;;  %v1530_v26 = vrot.slane %v1481_v2, 2  ;;  %v1600_v37 = vmul.f32 %v2649_v15, %v3288_v30 }
  0xb7   : > { %v1279_v48 = vadd.f32 %v3354_v14, %v1257_v6  ;;  %v1682_v0 = vrot.slane %v1633_v42, 1  ;;  %v1753_v19 = vmul.f32 %v3399_v43, %v2645_v12  ;;  %v1905_v60 = vmul.f32 %v3411_v32, %v2653_v17 }
  0xb8   : > { %v1887_v54 = vadd.f32 %v1871_v35, %v1855_v20  ;;  %v1411_v52 = vsel %vm492_vm0, %v1408_v53, %v1410_v25  ;;  %v1531_v34 = vsel %vm617_vm1, %v1528_v62, %v1530_v26  ;;  %v2073_v45 = vsel %vm617_vm1, %v2071_v44, %v2072_v22  ;;  %v3459_v20 = vld [vmem:[%s2641_s13 + $0x108] sm:$0xff]  ;;  %v3463_v26 = vld [vmem:[%s2641_s13 + $0x110] sm:$0xff] }
  0xb9   : > { %1295 = vst [vmem:[%s2776_s26 + $0x78] sm:$0xff] %v1279_v48  ;;  %v1464_v36 = vadd.f32 %v1411_v52, %v1328_v57  ;;  %v1802_v49 = vrot.slane %v1753_v19, 2  ;;  %v2025_v1 = vmul.f32 %v3411_v32, %v2664_v23  ;;  %v1683_v41 = vsel %vm492_vm0, %v1680_v3, %v1682_v0 }
  0xba   : > { %v2007_v4 = vadd.f32 %v1953_v40, %v1887_v54  ;;  %v1872_v53 = vmul.f32 %v3375_v5, %v2651_v16  ;;  %v1362_v62 = vmul.f32 %v2632_v9, %v3284_v28  ;;  %v1954_v59 = vrot.slane %v1905_v60, 1 }
  0xbb   : > { %v1584_v46 = vadd.f32 %v1531_v34, %v1464_v36  ;;  %v1329_v24 = vmul.f32 %v2630_v8, %v3284_v28  ;;  %v3436_v51 = vmul.f32 %v2632_v9, %v3288_v30  ;;  %v1803_v47 = vsel %vm617_vm1, %v1800_v33, %v1802_v49 }
  0xbc   : > { %v2127_v55 = vadd.f32 %v2073_v45, %v2007_v4  ;;  %v1412_v3 = vrot.slane %v1362_v62, 1  ;;  %v1482_v56 = vmul.f32 %v2634_v10, %v3284_v28  ;;  %v2074_v29 = vrot.slane %v2025_v1, 2 }
  0xbd   : > { %v1616_v27 = vadd.f32 %v1600_v37, %v1584_v46  ;;  %v1413_v13 = vrot.slane %v3436_v51, 1  ;;  %v1483_v61 = vmul.f32 %v2634_v10, %v3288_v30  ;;  %v1601_v63 = vmul.f32 %v3371_v50, %v2649_v15 }
  0xbe   : > { %v2143_v38 = vadd.f32 %v3354_v14, %v2127_v55  ;;  %v1532_v21 = vrot.slane %v1482_v56, 2  ;;  %v1634_v33 = vmul.f32 %v3371_v50, %v2643_v11  ;;  %v1635_v31 = vmul.f32 %v3375_v5, %v2643_v11 }
  0xbf   : > { %v1736_v7 = vadd.f32 %v1683_v41, %v1616_v27  ;;  %v1414_v28 = vsel %vm492_vm0, %v1412_v3, %v1413_v13  ;;  %v1533_v35 = vrot.slane %v1483_v61, 2  ;;  %v1754_v2 = vmul.f32 %v3371_v50, %v2645_v12  ;;  %v3497_v61 = vld [vmem:[%s2641_s13 + $0x118] sm:$0x3] }
  0xc0   : > { %2369 = vst [vmem:[%s2776_s26 + $0x80] sm:$0xff] %v2143_v38  ;;  %v1465_v44 = vadd.f32 %v1414_v28, %v1329_v24  ;;  %v1684_v58 = vrot.slane %v1634_v33, 1  ;;  %v1755_v6 = vmul.f32 %v3375_v5, %v2645_v12  ;;  %v1955_v42 = vsel %vm492_vm0, %v1952_v39, %v1954_v59 }
  0xc1   : > { %v1856_v57 = vadd.f32 %v1803_v47, %v1736_v7  ;;  %v1534_v40 = vsel %vm617_vm1, %v1532_v21, %v1533_v35  ;;  %v1685_v25 = vrot.slane %v1635_v31, 1  ;;  %v1804_v37 = vrot.slane %v1754_v2, 2 }
  0xc2   : > { %v1585_v48 = vadd.f32 %v1534_v40, %v1465_v44  ;;  %v1805_v0 = vrot.slane %v1755_v6, 2  ;;  %v1906_v19 = vmul.f32 %v3459_v20, %v2653_v17  ;;  %v3470_v34 = vmul.f32 %v3463_v26, %v2653_v17 }
  0xc3   : > { %v1888_v54 = vadd.f32 %v1872_v53, %v1856_v57  ;;  %v1686_v52 = vsel %vm492_vm0, %v1684_v58, %v1685_v25  ;;  %v2026_v39 = vmul.f32 %v3459_v20, %v2664_v23  ;;  %v2075_v60 = vsel %vm617_vm1, %v2072_v22, %v2074_v29 }
  0xc4   : > { %v1617_v45 = vadd.f32 %v1601_v63, %v1585_v48  ;;  %v1956_v36 = vrot.slane %v1906_v19, 1  ;;  %v3479_v49 = vmul.f32 %v3463_v26, %v2664_v23  ;;  %v1806_v4 = vsel %vm617_vm1, %v1804_v37, %v1805_v0 }
  0xc5   : > { %v2008_v1 = vadd.f32 %v1955_v42, %v1888_v54  ;;  %v1873_v41 = vmul.f32 %v3459_v20, %v2651_v16  ;;  %v1957_v53 = vrot.slane %v3470_v34, 1  ;;  %v2076_v46 = vrot.slane %v2026_v39, 2 }
  0xc6   : > { %v1737_v62 = vadd.f32 %v1686_v52, %v1617_v45  ;;  %v1364_v18 = vmul.f32 %v3399_v43, %v2632_v9  ;;  %v1484_v22 = vmul.f32 %v3399_v43, %v2634_v10  ;;  %v2077_v24 = vrot.slane %v3479_v49, 2 }
  0xc7   : > { %v2128_v59 = vadd.f32 %v2075_v60, %v2008_v1  ;;  %v1330_v51 = vmul.f32 %v2630_v8, %v3288_v30  ;;  %v1636_v55 = vmul.f32 %v3411_v32, %v2643_v11  ;;  %v1958_v3 = vsel %vm492_vm0, %v1956_v36, %v1957_v53 }
  0xc8   : > { %v1857_v47 = vadd.f32 %v1806_v4, %v1737_v62  ;;  %v1415_v56 = vrot.slane %v1364_v18, 1  ;;  %v1535_v27 = vrot.slane %v1484_v22, 2  ;;  %v1602_v43 = vmul.f32 %v3375_v5, %v2649_v15 }
  0xc9   : > { %v2144_v29 = vadd.f32 %v3354_v14, %v2128_v59  ;;  %v1687_v38 = vrot.slane %v1636_v55, 1  ;;  %v1756_v21 = vmul.f32 %v3411_v32, %v2645_v12  ;;  %v1908_v7 = vmul.f32 %v3497_v61, %v2653_v17 }
  0xca   : > { %v1889_v30 = vadd.f32 %v1873_v41, %v1857_v47  ;;  %v1416_v63 = vsel %vm492_vm0, %v1413_v13, %v1415_v56  ;;  %v1536_v33 = vsel %vm617_vm1, %v1533_v35, %v1535_v27  ;;  %v2078_v28 = vsel %vm617_vm1, %v2076_v46, %v2077_v24  ;;  %v3545_v47 = vld [vmem:[%s2641_s13 + $0x120] sm:$0xff]  ;;  %v3549_v27 = vld [vmem:[%s2641_s13 + $0x128] sm:$0xff] }
  0xcb   : > { %2370 = vst [vmem:[%s2776_s26 + $0x88] sm:$0xff] %v2144_v29  ;;  %v1466_v31 = vadd.f32 %v1416_v63, %v1330_v51  ;;  %v1807_v44 = vrot.slane %v1756_v21, 2  ;;  %v2028_v58 = vmul.f32 %v3497_v61, %v2664_v23  ;;  %v1688_v6 = vsel %vm492_vm0, %v1685_v25, %v1687_v38 }
  0xcc   : > { %v2009_v2 = vadd.f32 %v1958_v3, %v1889_v30  ;;  %v1874_v13 = vmul.f32 %v3463_v26, %v2651_v16  ;;  %v1365_v35 = vmul.f32 %v3371_v50, %v2632_v9  ;;  %v1959_v42 = vrot.slane %v1908_v7, 1 }
  0xcd   : > { %v1586_v57 = vadd.f32 %v1536_v33, %v1466_v31  ;;  %v1331_v40 = vmul.f32 %v3371_v50, %v2630_v8  ;;  %v3522_v48 = vmul.f32 %v3375_v5, %v2632_v9  ;;  %v1808_v19 = vsel %vm617_vm1, %v1805_v0, %v1807_v44 }
  0xce   : > { %v2129_v37 = vadd.f32 %v2078_v28, %v2009_v2  ;;  %v1417_v25 = vrot.slane %v1365_v35, 1  ;;  %v1485_v54 = vmul.f32 %v3371_v50, %v2634_v10  ;;  %v2079_v34 = vrot.slane %v2028_v58, 2 }
  0xcf   : > { %v1618_v52 = vadd.f32 %v1602_v43, %v1586_v57  ;;  %v1418_v39 = vrot.slane %v3522_v48, 1  ;;  %v1486_v60 = vmul.f32 %v3375_v5, %v2634_v10  ;;  %v1603_v1 = vmul.f32 %v3459_v20, %v2649_v15 }
  0xd0   : > { %v2145_v45 = vadd.f32 %v3354_v14, %v2129_v37  ;;  %v1537_v36 = vrot.slane %v1485_v54, 2  ;;  %v1637_v0 = vmul.f32 %v3459_v20, %v2643_v11  ;;  %v1638_v62 = vmul.f32 %v3463_v26, %v2643_v11 }
  0xd1   : > { %v1738_v4 = vadd.f32 %v1688_v6, %v1618_v52  ;;  %v1419_v50 = vsel %vm492_vm0, %v1417_v25, %v1418_v39  ;;  %v1538_v41 = vrot.slane %v1486_v60, 2  ;;  %v1757_v22 = vmul.f32 %v3459_v20, %v2645_v12  ;;  %v3583_v60 = vld [vmem:[%s2641_s13 + $0x130] sm:$0x3] }
  0xd2   : > { %2371 = vst [vmem:[%s2776_s26 + $0x90] sm:$0xff] %v2145_v45  ;;  %v1467_v46 = vadd.f32 %v1419_v50, %v1331_v40  ;;  %v1689_v18 = vrot.slane %v1637_v0, 1  ;;  %v1758_v59 = vmul.f32 %v3463_v26, %v2645_v12  ;;  %v1960_v55 = vsel %vm492_vm0, %v1957_v53, %v1959_v42 }
  0xd3   : > { %v1858_v51 = vadd.f32 %v1808_v19, %v1738_v4  ;;  %v1539_v3 = vsel %vm617_vm1, %v1537_v36, %v1538_v41  ;;  %v1690_v56 = vrot.slane %v1638_v62, 1  ;;  %v1809_v43 = vrot.slane %v1757_v22, 2 }
  0xd4   : > { %v1587_v29 = vadd.f32 %v1539_v3, %v1467_v46  ;;  %v1810_v38 = vrot.slane %v1758_v59, 2  ;;  %v1909_v21 = vmul.f32 %v3545_v47, %v2653_v17  ;;  %v3556_v33 = vmul.f32 %v3549_v27, %v2653_v17 }
  0xd5   : > { %v1890_v30 = vadd.f32 %v1874_v13, %v1858_v51  ;;  %v1691_v63 = vsel %vm492_vm0, %v1689_v18, %v1690_v56  ;;  %v2029_v53 = vmul.f32 %v3545_v47, %v2664_v23  ;;  %v2080_v7 = vsel %vm617_vm1, %v2077_v24, %v2079_v34 }
  0xd6   : > { %v1619_v28 = vadd.f32 %v1603_v1, %v1587_v29  ;;  %v1961_v31 = vrot.slane %v1909_v21, 1  ;;  %v3565_v44 = vmul.f32 %v3549_v27, %v2664_v23  ;;  %v1811_v2 = vsel %vm617_vm1, %v1809_v43, %v1810_v38 }
  0xd7   : > { %v2010_v58 = vadd.f32 %v1960_v55, %v1890_v30  ;;  %v1875_v6 = vmul.f32 %v3545_v47, %v2651_v16  ;;  %v1962_v13 = vrot.slane %v3556_v33, 1  ;;  %v2081_v57 = vrot.slane %v2029_v53, 2 }
  0xd8   : > { %v1739_v35 = vadd.f32 %v1691_v63, %v1619_v28  ;;  %v1367_v49 = vmul.f32 %v3411_v32, %v2632_v9  ;;  %v1487_v24 = vmul.f32 %v3411_v32, %v2634_v10  ;;  %v2082_v40 = vrot.slane %v3565_v44, 2 }
  0xd9   : > { %v2130_v42 = vadd.f32 %v2080_v7, %v2010_v58  ;;  %v1332_v48 = vmul.f32 %v3375_v5, %v2630_v8  ;;  %v1639_v37 = vmul.f32 %v3497_v61, %v2643_v11  ;;  %v1963_v25 = vsel %vm492_vm0, %v1961_v31, %v1962_v13 }
  0xda   : > { %v1859_v19 = vadd.f32 %v1811_v2, %v1739_v35  ;;  %v1420_v54 = vrot.slane %v1367_v49, 1  ;;  %v1540_v52 = vrot.slane %v1487_v24, 2  ;;  %v1604_v32 = vmul.f32 %v3463_v26, %v2649_v15 }
  0xdb   : > { %v2146_v34 = vadd.f32 %v3354_v14, %v2130_v42  ;;  %v1692_v45 = vrot.slane %v1639_v37, 1  ;;  %v1759_v36 = vmul.f32 %v3497_v61, %v2645_v12  ;;  %v1911_v4 = vmul.f32 %v3583_v60, %v2653_v17 }
  0xdc   : > { %v1891_v5 = vadd.f32 %v1875_v6, %v1859_v19  ;;  %v1421_v1 = vsel %vm492_vm0, %v1418_v39, %v1420_v54  ;;  %v1541_v0 = vsel %vm617_vm1, %v1538_v41, %v1540_v52  ;;  %v2083_v50 = vsel %vm617_vm1, %v2081_v57, %v2082_v40  ;;  %v3631_v19 = vld [vmem:[%s2641_s13 + $0x138] sm:$0xff]  ;;  %v3635_v52 = vld [vmem:[%s2641_s13 + $0x140] sm:$0xff] }
  0xdd   : > { %2372 = vst [vmem:[%s2776_s26 + $0x98] sm:$0xff] %v2146_v34  ;;  %v1468_v62 = vadd.f32 %v1421_v1, %v1332_v48  ;;  %v1812_v46 = vrot.slane %v1759_v36, 2  ;;  %v2031_v18 = vmul.f32 %v3583_v60, %v2664_v23  ;;  %v1693_v59 = vsel %vm492_vm0, %v1690_v56, %v1692_v45 }
  0xde   : > { %v2011_v22 = vadd.f32 %v1963_v25, %v1891_v5  ;;  %v1876_v39 = vmul.f32 %v3549_v27, %v2651_v16  ;;  %v1368_v41 = vmul.f32 %v3459_v20, %v2632_v9  ;;  %v1964_v55 = vrot.slane %v1911_v4, 1 }
  0xdf   : > { %v1588_v51 = vadd.f32 %v1541_v0, %v1468_v62  ;;  %v1333_v3 = vmul.f32 %v3459_v20, %v2630_v8  ;;  %v3608_v29 = vmul.f32 %v3463_v26, %v2632_v9  ;;  %v1813_v21 = vsel %vm617_vm1, %v1810_v38, %v1812_v46 }
  0xe0   : > { %v2131_v43 = vadd.f32 %v2083_v50, %v2011_v22  ;;  %v1422_v56 = vrot.slane %v1368_v41, 1  ;;  %v1488_v30 = vmul.f32 %v3459_v20, %v2634_v10  ;;  %v2084_v33 = vrot.slane %v2031_v18, 2 }
  0xe1   : > { %v1620_v63 = vadd.f32 %v1604_v32, %v1588_v51  ;;  %v1423_v53 = vrot.slane %v3608_v29, 1  ;;  %v1489_v7 = vmul.f32 %v3463_v26, %v2634_v10  ;;  %v1605_v58 = vmul.f32 %v3545_v47, %v2649_v15 }
  0xe2   : > { %v2147_v28 = vadd.f32 %v3354_v14, %v2131_v43  ;;  %v1542_v31 = vrot.slane %v1488_v30, 2  ;;  %v1640_v38 = vmul.f32 %v3545_v47, %v2643_v11  ;;  %v1641_v35 = vmul.f32 %v3549_v27, %v2643_v11 }
  0xe3   : > { %v1740_v2 = vadd.f32 %v1693_v59, %v1620_v63  ;;  %v1424_v20 = vsel %vm492_vm0, %v1422_v56, %v1423_v53  ;;  %v1543_v6 = vrot.slane %v1489_v7, 2  ;;  %v1760_v24 = vmul.f32 %v3545_v47, %v2645_v12  ;;  %v3669_v7 = vld [vmem:[%s2641_s13 + $0x148] sm:$0x3] }
  0xe4   : > { %2373 = vst [vmem:[%s2776_s26 + $0xa0] sm:$0xff] %v2147_v28  ;;  %v1469_v57 = vadd.f32 %v1424_v20, %v1333_v3  ;;  %v1694_v49 = vrot.slane %v1640_v38, 1  ;;  %v1761_v42 = vmul.f32 %v3549_v27, %v2645_v12  ;;  %v1965_v37 = vsel %vm492_vm0, %v1962_v13, %v1964_v55 }
  0xe5   : > { %v1860_v48 = vadd.f32 %v1813_v21, %v1740_v2  ;;  %v1544_v25 = vsel %vm617_vm1, %v1542_v31, %v1543_v6  ;;  %v1695_v54 = vrot.slane %v1641_v35, 1  ;;  %v1814_v32 = vrot.slane %v1760_v24, 2 }
  0xe6   : > { %v1589_v34 = vadd.f32 %v1544_v25, %v1469_v57  ;;  %v1815_v45 = vrot.slane %v1761_v42, 2  ;;  %v1912_v36 = vmul.f32 %v3631_v19, %v2653_v17  ;;  %v3642_v0 = vmul.f32 %v3635_v52, %v2653_v17 }
  0xe7   : > { %v1892_v5 = vadd.f32 %v1876_v39, %v1860_v48  ;;  %v1696_v1 = vsel %vm492_vm0, %v1694_v49, %v1695_v54  ;;  %v2032_v13 = vmul.f32 %v3631_v19, %v2664_v23  ;;  %v2085_v4 = vsel %vm617_vm1, %v2082_v40, %v2084_v33 }
  0xe8   : > { %v1621_v50 = vadd.f32 %v1605_v58, %v1589_v34  ;;  %v1966_v62 = vrot.slane %v1912_v36, 1  ;;  %v3651_v46 = vmul.f32 %v3635_v52, %v2664_v23  ;;  %v1816_v22 = vsel %vm617_vm1, %v1814_v32, %v1815_v45 }
  0xe9   : > { %v2012_v18 = vadd.f32 %v1965_v37, %v1892_v5  ;;  %v1877_v59 = vmul.f32 %v3631_v19, %v2651_v16  ;;  %v1967_v39 = vrot.slane %v3642_v0, 1  ;;  %v2086_v51 = vrot.slane %v2032_v13, 2 }
  0xea   : > { %v1741_v41 = vadd.f32 %v1696_v1, %v1621_v50  ;;  %v1370_v44 = vmul.f32 %v3497_v61, %v2632_v9  ;;  %v1490_v40 = vmul.f32 %v3497_v61, %v2634_v10  ;;  %v2087_v3 = vrot.slane %v3651_v46, 2 }
  0xeb   : > { %v2132_v55 = vadd.f32 %v2085_v4, %v2012_v18  ;;  %v1334_v29 = vmul.f32 %v3463_v26, %v2630_v8  ;;  %v1642_v43 = vmul.f32 %v3583_v60, %v2643_v11  ;;  %v1968_v56 = vsel %vm492_vm0, %v1966_v62, %v1967_v39 }
  0xec   : > { %v1861_v21 = vadd.f32 %v1816_v22, %v1741_v41  ;;  %v1425_v30 = vrot.slane %v1370_v44, 1  ;;  %v1545_v63 = vrot.slane %v1490_v40, 2  ;;  %v1606_v61 = vmul.f32 %v3549_v27, %v2649_v15 }
  0xed   : > { %v2148_v33 = vadd.f32 %v3354_v14, %v2132_v55  ;;  %v1697_v28 = vrot.slane %v1642_v43, 1  ;;  %v1762_v31 = vmul.f32 %v3583_v60, %v2645_v12  ;;  %v1914_v2 = vmul.f32 %v3669_v7, %v2653_v17 }
  0xee   : > { %v1893_v26 = vadd.f32 %v1877_v59, %v1861_v21  ;;  %v1426_v58 = vsel %vm492_vm0, %v1423_v53, %v1425_v30  ;;  %v1546_v38 = vsel %vm617_vm1, %v1543_v6, %v1545_v63  ;;  %v2088_v20 = vsel %vm617_vm1, %v2086_v51, %v2087_v3  ;;  %v3717_v21 = vld [vmem:[%s2641_s13 + $0x150] sm:$0xff]  ;;  %v3721_v63 = vld [vmem:[%s2641_s13 + $0x158] sm:$0xff] }
  0xef   : > { %2374 = vst [vmem:[%s2776_s26 + $0xa8] sm:$0xff] %v2148_v33  ;;  %v1470_v35 = vadd.f32 %v1426_v58, %v1334_v29  ;;  %v1817_v57 = vrot.slane %v1762_v31, 2  ;;  %v2034_v49 = vmul.f32 %v3669_v7, %v2664_v23  ;;  %v1698_v42 = vsel %vm492_vm0, %v1695_v54, %v1697_v28 }
  0xf0   : > { %v2013_v24 = vadd.f32 %v1968_v56, %v1893_v26  ;;  %v1878_v53 = vmul.f32 %v3635_v52, %v2651_v16  ;;  %v1371_v6 = vmul.f32 %v3545_v47, %v2632_v9  ;;  %v1969_v37 = vrot.slane %v1914_v2, 1 }
  0xf1   : > { %v1590_v48 = vadd.f32 %v1546_v38, %v1470_v35  ;;  %v1335_v25 = vmul.f32 %v3545_v47, %v2630_v8  ;;  %v3694_v34 = vmul.f32 %v3549_v27, %v2632_v9  ;;  %v1818_v36 = vsel %vm617_vm1, %v1815_v45, %v1817_v57 }
  0xf2   : > { %v2133_v32 = vadd.f32 %v2088_v20, %v2013_v24  ;;  %v1427_v54 = vrot.slane %v1371_v6, 1  ;;  %v1491_v5 = vmul.f32 %v3545_v47, %v2634_v10  ;;  %v2089_v0 = vrot.slane %v2034_v49, 2 }
  0xf3   : > { %v1622_v1 = vadd.f32 %v1606_v61, %v1590_v48  ;;  %v1428_v13 = vrot.slane %v3694_v34, 1  ;;  %v1492_v4 = vmul.f32 %v3549_v27, %v2634_v10  ;;  %v1607_v18 = vmul.f32 %v3631_v19, %v2649_v15 }
  0xf4   : > { %v2149_v50 = vadd.f32 %v3354_v14, %v2133_v32  ;;  %v1547_v62 = vrot.slane %v1491_v5, 2  ;;  %v1643_v45 = vmul.f32 %v3631_v19, %v2643_v11  ;;  %v1644_v41 = vmul.f32 %v3635_v52, %v2643_v11 }
  0xf5   : > { %v1742_v22 = vadd.f32 %v1698_v42, %v1622_v1  ;;  %v1429_v47 = vsel %vm492_vm0, %v1427_v54, %v1428_v13  ;;  %v1548_v59 = vrot.slane %v1492_v4, 2  ;;  %v1763_v40 = vmul.f32 %v3631_v19, %v2645_v12  ;;  %v3755_v4 = vld [vmem:[%s2641_s13 + $0x160] sm:$0x3] }
  0xf6   : > { %2375 = vst [vmem:[%s2776_s26 + $0xb0] sm:$0xff] %v2149_v50  ;;  %v1471_v51 = vadd.f32 %v1429_v47, %v1335_v25  ;;  %v1699_v44 = vrot.slane %v1643_v45, 1  ;;  %v1764_v55 = vmul.f32 %v3635_v52, %v2645_v12  ;;  %v1970_v43 = vsel %vm492_vm0, %v1967_v39, %v1969_v37 }
  0xf7   : > { %v1862_v29 = vadd.f32 %v1818_v36, %v1742_v22  ;;  %v1549_v56 = vsel %vm617_vm1, %v1547_v62, %v1548_v59  ;;  %v1700_v30 = vrot.slane %v1644_v41, 1  ;;  %v1819_v61 = vrot.slane %v1763_v40, 2 }
  0xf8   : > { %v1591_v33 = vadd.f32 %v1549_v56, %v1471_v51  ;;  %v1820_v28 = vrot.slane %v1764_v55, 2  ;;  %v1915_v31 = vmul.f32 %v3717_v21, %v2653_v17  ;;  %v3728_v38 = vmul.f32 %v3721_v63, %v2653_v17 }
  0xf9   : > { %v1894_v26 = vadd.f32 %v1878_v53, %v1862_v29  ;;  %v1701_v58 = vsel %vm492_vm0, %v1699_v44, %v1700_v30  ;;  %v2035_v39 = vmul.f32 %v3717_v21, %v2664_v23  ;;  %v2090_v2 = vsel %vm617_vm1, %v2087_v3, %v2089_v0 }
  0xfa   : > { %v1623_v20 = vadd.f32 %v1607_v18, %v1591_v33  ;;  %v1971_v35 = vrot.slane %v1915_v31, 1  ;;  %v3737_v57 = vmul.f32 %v3721_v63, %v2664_v23  ;;  %v1821_v24 = vsel %vm617_vm1, %v1819_v61, %v1820_v28 }
  0xfb   : > { %v2014_v49 = vadd.f32 %v1970_v43, %v1894_v26  ;;  %v1879_v42 = vmul.f32 %v3717_v21, %v2651_v16  ;;  %v1972_v53 = vrot.slane %v3728_v38, 1  ;;  %v2091_v48 = vrot.slane %v2035_v39, 2 }
  0xfc   : > { %v1743_v6 = vadd.f32 %v1701_v58, %v1623_v20  ;;  %v1373_v46 = vmul.f32 %v3583_v60, %v2632_v9  ;;  %v1493_v3 = vmul.f32 %v3583_v60, %v2634_v10  ;;  %v2092_v25 = vrot.slane %v3737_v57, 2 }
  0xfd   : > { %v2134_v37 = vadd.f32 %v2090_v2, %v2014_v49  ;;  %v1336_v34 = vmul.f32 %v3549_v27, %v2630_v8  ;;  %v1645_v32 = vmul.f32 %v3669_v7, %v2643_v11  ;;  %v1973_v54 = vsel %vm492_vm0, %v1971_v35, %v1972_v53 }
  0xfe   : > { %v1863_v36 = vadd.f32 %v1821_v24, %v1743_v6  ;;  %v1430_v5 = vrot.slane %v1373_v46, 1  ;;  %v1550_v1 = vrot.slane %v1493_v3, 2  ;;  %v1608_v60 = vmul.f32 %v3635_v52, %v2649_v15 }
  0xff   : > { %v2150_v0 = vadd.f32 %v3354_v14, %v2134_v37  ;;  %v1702_v50 = vrot.slane %v1645_v32, 1  ;;  %v1765_v62 = vmul.f32 %v3669_v7, %v2645_v12  ;;  %v1917_v22 = vmul.f32 %v3755_v4, %v2653_v17 }
 0x100   : > { %v1895_v27 = vadd.f32 %v1879_v42, %v1863_v36  ;;  %v1431_v18 = vsel %vm492_vm0, %v1428_v13, %v1430_v5  ;;  %v1551_v45 = vsel %vm617_vm1, %v1548_v59, %v1550_v1  ;;  %v2093_v47 = vsel %vm617_vm1, %v2091_v48, %v2092_v25  ;;  %v3803_v36 = vld [vmem:[%s2641_s13 + $0x168] sm:$0xff]  ;;  %v3807_v1 = vld [vmem:[%s2641_s13 + $0x170] sm:$0xff] }
 0x101   : > { %2376 = vst [vmem:[%s2776_s26 + $0xb8] sm:$0xff] %v2150_v0  ;;  %v1472_v41 = vadd.f32 %v1431_v18, %v1336_v34  ;;  %v1822_v51 = vrot.slane %v1765_v62, 2  ;;  %v2037_v44 = vmul.f32 %v3755_v4, %v2664_v23  ;;  %v1703_v55 = vsel %vm492_vm0, %v1700_v30, %v1702_v50 }
 0x102   : > { %v2015_v40 = vadd.f32 %v1973_v54, %v1895_v27  ;;  %v1880_v13 = vmul.f32 %v3721_v63, %v2651_v16  ;;  %v1374_v59 = vmul.f32 %v3631_v19, %v2632_v9  ;;  %v1974_v43 = vrot.slane %v1917_v22, 1 }
 0x103   : > { %v1592_v29 = vadd.f32 %v1551_v45, %v1472_v41  ;;  %v1337_v56 = vmul.f32 %v3631_v19, %v2630_v8  ;;  %v3780_v33 = vmul.f32 %v3635_v52, %v2632_v9  ;;  %v1823_v31 = vsel %vm617_vm1, %v1820_v28, %v1822_v51 }
 0x104   : > { %v2135_v61 = vadd.f32 %v2093_v47, %v2015_v40  ;;  %v1432_v30 = vrot.slane %v1374_v59, 1  ;;  %v1494_v26 = vmul.f32 %v3631_v19, %v2634_v10  ;;  %v2094_v38 = vrot.slane %v2037_v44, 2 }
 0x105   : > { %v1624_v58 = vadd.f32 %v1608_v60, %v1592_v29  ;;  %v1433_v39 = vrot.slane %v3780_v33, 1  ;;  %v1495_v2 = vmul.f32 %v3635_v52, %v2634_v10  ;;  %v1609_v49 = vmul.f32 %v3717_v21, %v2649_v15 }
 0x106   : > { %v2151_v20 = vadd.f32 %v3354_v14, %v2135_v61  ;;  %v1552_v35 = vrot.slane %v1494_v26, 2  ;;  %v1646_v28 = vmul.f32 %v3717_v21, %v2643_v11  ;;  %v1647_v6 = vmul.f32 %v3721_v63, %v2643_v11 }
 0x107   : > { %v1744_v24 = vadd.f32 %v1703_v55, %v1624_v58  ;;  %v1434_v19 = vsel %vm492_vm0, %v1432_v30, %v1433_v39  ;;  %v1553_v42 = vrot.slane %v1495_v2, 2  ;;  %v1766_v3 = vmul.f32 %v3717_v21, %v2645_v12  ;;  %v3841_v2 = vld [vmem:[%s2641_s13 + $0x178] sm:$0x3] }
 0x108   : > { %2377 = vst [vmem:[%s2776_s26 + $0xc0] sm:$0xff] %v2151_v20  ;;  %v1473_v48 = vadd.f32 %v1434_v19, %v1337_v56  ;;  %v1704_v46 = vrot.slane %v1646_v28, 1  ;;  %v1767_v37 = vmul.f32 %v3721_v63, %v2645_v12  ;;  %v1975_v32 = vsel %vm492_vm0, %v1972_v53, %v1974_v43 }
 0x109   : > { %v1864_v34 = vadd.f32 %v1823_v31, %v1744_v24  ;;  %v1554_v54 = vsel %vm617_vm1, %v1552_v35, %v1553_v42  ;;  %v1705_v5 = vrot.slane %v1647_v6, 1  ;;  %v1824_v60 = vrot.slane %v1766_v3, 2 }
 0x10a   : > { %v1593_v0 = vadd.f32 %v1554_v54, %v1473_v48  ;;  %v1825_v50 = vrot.slane %v1767_v37, 2  ;;  %v1918_v62 = vmul.f32 %v3803_v36, %v2653_v17  ;;  %v3814_v45 = vmul.f32 %v3807_v1, %v2653_v17 }
 0x10b   : > { %v1896_v27 = vadd.f32 %v1880_v13, %v1864_v34  ;;  %v1706_v18 = vsel %vm492_vm0, %v1704_v46, %v1705_v5  ;;  %v2038_v53 = vmul.f32 %v3803_v36, %v2664_v23  ;;  %v2095_v22 = vsel %vm617_vm1, %v2092_v25, %v2094_v38 }
 0x10c   : > { %v1625_v47 = vadd.f32 %v1609_v49, %v1593_v0  ;;  %v1976_v41 = vrot.slane %v1918_v62, 1  ;;  %v3823_v51 = vmul.f32 %v3807_v1, %v2664_v23  ;;  %v1826_v40 = vsel %vm617_vm1, %v1824_v60, %v1825_v50 }
 0x10d   : > { %v2016_v44 = vadd.f32 %v1975_v32, %v1896_v27  ;;  %v1881_v55 = vmul.f32 %v3803_v36, %v2651_v16  ;;  %v1977_v13 = vrot.slane %v3814_v45, 1  ;;  %v2096_v29 = vrot.slane %v2038_v53, 2 }
 0x10e   : > { %v1745_v59 = vadd.f32 %v1706_v18, %v1625_v47  ;;  %v1376_v57 = vmul.f32 %v3669_v7, %v2632_v9  ;;  %v1496_v25 = vmul.f32 %v3669_v7, %v2634_v10  ;;  %v2097_v56 = vrot.slane %v3823_v51, 2 }
 0x10f   : > { %v2136_v43 = vadd.f32 %v2095_v22, %v2016_v44  ;;  %v1338_v33 = vmul.f32 %v3635_v52, %v2630_v8  ;;  %v1648_v61 = vmul.f32 %v3755_v4, %v2643_v11  ;;  %v1978_v30 = vsel %vm492_vm0, %v1976_v41, %v1977_v13 }
 0x110   : > { %v1865_v31 = vadd.f32 %v1826_v40, %v1745_v59  ;;  %v1435_v26 = vrot.slane %v1376_v57, 1  ;;  %v1555_v58 = vrot.slane %v1496_v25, 2  ;;  %v1610_v7 = vmul.f32 %v3721_v63, %v2649_v15 }
 0x111   : > { %v2152_v38 = vadd.f32 %v3354_v14, %v2136_v43  ;;  %v1707_v20 = vrot.slane %v1648_v61, 1  ;;  %v1768_v35 = vmul.f32 %v3755_v4, %v2645_v12  ;;  %v1920_v24 = vmul.f32 %v3841_v2, %v2653_v17  ;;  %v3896_v61 = vld [vmem:[%s3880_s8] sm:$0xff] }
 0x112   : > { %v1897_v52 = vadd.f32 %v1881_v55, %v1865_v31  ;;  %v1436_v49 = vsel %vm492_vm0, %v1433_v39, %v1435_v26  ;;  %v1556_v28 = vsel %vm617_vm1, %v1553_v42, %v1555_v58  ;;  %v2098_v19 = vsel %vm617_vm1, %v2096_v29, %v2097_v56  ;;  %v3900_v26 = vld [vmem:[%s3880_s8 + $0x8] sm:$0xff] }
 0x113   : > { %2378 = vst [vmem:[%s2776_s26 + $0xc8] sm:$0xff] %v2152_v38  ;;  %v1474_v6 = vadd.f32 %v1436_v49, %v1338_v33  ;;  %v1827_v48 = vrot.slane %v1768_v35, 2  ;;  %v2040_v46 = vmul.f32 %v3841_v2, %v2664_v23  ;;  %v1708_v37 = vsel %vm492_vm0, %v1705_v5, %v1707_v20 }
 0x114   : > { %v2017_v3 = vadd.f32 %v1978_v30, %v1897_v52  ;;  %v1882_v39 = vmul.f32 %v3807_v1, %v2651_v16  ;;  %v1377_v42 = vmul.f32 %v3717_v21, %v2632_v9  ;;  %v1979_v32 = vrot.slane %v1920_v24, 1 }
 0x115   : > { %v1594_v34 = vadd.f32 %v1556_v28, %v1474_v6  ;;  %v1339_v54 = vmul.f32 %v3717_v21, %v2630_v8  ;;  %v3868_v0 = vmul.f32 %v3721_v63, %v2632_v9  ;;  %v1828_v5 = vsel %vm617_vm1, %v1825_v50, %v1827_v48 }
 0x116   : > { %v2137_v60 = vadd.f32 %v2098_v19, %v2017_v3  ;;  %v1437_v62 = vrot.slane %v1377_v42, 1  ;;  %v1497_v27 = vmul.f32 %v3717_v21, %v2634_v10  ;;  %v2099_v45 = vrot.slane %v2040_v46, 2 }
 0x117   : > { %v1626_v18 = vadd.f32 %v1610_v7, %v1594_v34  ;;  %v1438_v53 = vrot.slane %v3868_v0, 1  ;;  %v1498_v22 = vmul.f32 %v3721_v63, %v2634_v10  ;;  %v1611_v41 = vmul.f32 %v3803_v36, %v2649_v15 }
 0x118   : > { %v2153_v47 = vadd.f32 %v3354_v14, %v2137_v60  ;;  %v1557_v50 = vrot.slane %v1497_v27, 2  ;;  %v1649_v21 = vmul.f32 %v3803_v36, %v2643_v11  ;;  %v1650_v14 = vmul.f32 %v3807_v1, %v2643_v11 }
 0x119   : > { %v1746_v44 = vadd.f32 %v1708_v37, %v1626_v18  ;;  %v1439_v40 = vsel %vm492_vm0, %v1437_v62, %v1438_v53  ;;  %v1558_v55 = vrot.slane %v1498_v22, 2  ;;  %v1769_v57 = vmul.f32 %v3803_v36, %v2645_v12  ;;  %v3935_v18 = vld [vmem:[%s4085_s3] ss:$0 sm:$0xff] }
 0x11a   : > { %2379 = vst [vmem:[%s2776_s26 + $0xd0] sm:$0xff] %v2153_v47  ;;  %v1475_v59 = vadd.f32 %v1439_v40, %v1339_v54  ;;  %v1709_v29 = vrot.slane %v1649_v21, 1  ;;  %v1770_v25 = vmul.f32 %v3807_v1, %v2645_v12  ;;  %v1980_v33 = vsel %vm492_vm0, %v1977_v13, %v1979_v32 }
 0x11b   : > { %v1866_v43 = vadd.f32 %v1828_v5, %v1746_v44  ;;  %v1559_v31 = vsel %vm617_vm1, %v1557_v50, %v1558_v55  ;;  %v1710_v30 = vrot.slane %v1650_v14, 1  ;;  %v1829_v38 = vrot.slane %v1769_v57, 2 }
 0x11c   : > { %v1595_v58 = vadd.f32 %v1559_v31, %v1475_v59  ;;  %v1830_v7 = vrot.slane %v1770_v25, 2  ;;  %v1921_v20 = vmul.f32 %v3896_v61, %v2653_v17  ;;  %v3907_v49 = vmul.f32 %v3900_v26, %v2653_v17 }
 0x11d   : > { %v1898_v35 = vadd.f32 %v1882_v39, %v1866_v43  ;;  %v1711_v52 = vsel %vm492_vm0, %v1709_v29, %v1710_v30  ;;  %v2041_v13 = vmul.f32 %v3896_v61, %v2664_v23  ;;  %v2100_v28 = vsel %vm617_vm1, %v2097_v56, %v2099_v45  ;;  %v3939_v45 = vld [vmem:[%s3880_s8 + $0x10] sm:$0x3] }
 0x11e   : > { %v1627_v24 = vadd.f32 %v1611_v41, %v1595_v58  ;;  %v1981_v19 = vrot.slane %v1921_v20, 1  ;;  %v3916_v6 = vmul.f32 %v3900_v26, %v2664_v23  ;;  %v1831_v46 = vsel %vm617_vm1, %v1829_v38, %v1830_v7 }
 0x11f   : > { %v2018_v48 = vadd.f32 %v1980_v33, %v1898_v35  ;;  %v1883_v3 = vmul.f32 %v3896_v61, %v2651_v16  ;;  %v1982_v37 = vrot.slane %v3907_v49, 1  ;;  %v2101_v42 = vrot.slane %v2041_v13, 2 }
 0x120   : > { %v1747_v39 = vadd.f32 %v1711_v52, %v1627_v24  ;;  %v1379_v51 = vmul.f32 %v3755_v4, %v2632_v9  ;;  %v1499_v56 = vmul.f32 %v3755_v4, %v2634_v10  ;;  %v2102_v32 = vrot.slane %v3916_v6, 2 }
 0x121   : > { %v2138_v34 = vadd.f32 %v2100_v28, %v2018_v48  ;;  %v1340_v54 = vmul.f32 %v3721_v63, %v2630_v8  ;;  %v1651_v0 = vmul.f32 %v3841_v2, %v2643_v11  ;;  %v1983_v5 = vsel %vm492_vm0, %v1981_v19, %v1982_v37 }
 0x122   : > { %v1867_v60 = vadd.f32 %v1831_v46, %v1747_v39  ;;  %v1440_v62 = vrot.slane %v1379_v51, 1  ;;  %v1560_v27 = vrot.slane %v1499_v56, 2  ;;  %v1612_v63 = vmul.f32 %v3807_v1, %v2649_v15  ;;  %v1325_v51 = vld [vmem:[%s3880_s8 + $0x20] sm:$0xff] }
 0x123   : > { %v2154_v4 = vadd.f32 %v3935_v18, %v2138_v34  ;;  %v1712_v22 = vrot.slane %v1651_v0, 1  ;;  %v1771_v47 = vmul.f32 %v3841_v2, %v2645_v12  ;;  %v1923_v44 = vmul.f32 %v3939_v45, %v2653_v17 }
 0x124   : > { %v1899_v50 = vadd.f32 %v1883_v3, %v1867_v60  ;;  %v1441_v41 = vsel %vm492_vm0, %v1438_v53, %v1440_v62  ;;  %v1561_v21 = vsel %vm617_vm1, %v1558_v55, %v1560_v27  ;;  %v2103_v40 = vsel %vm617_vm1, %v2101_v42, %v2102_v32  ;;  %v1324_v3 = vld [vmem:[%s3880_s8 + $0x18] sm:$0xff] }
 0x125   : > { %2380 = vst [vmem:[%s2776_s26 + $0xd8] sm:$0xff] %v2154_v4  ;;  %v1476_v14 = vadd.f32 %v1441_v41, %v1340_v54  ;;  %v1832_v59 = vrot.slane %v1771_v47, 2  ;;  %v2043_v29 = vmul.f32 %v3939_v45, %v2664_v23  ;;  %v1713_v25 = vsel %vm492_vm0, %v1710_v30, %v1712_v22 }
 0x126   : > { %v2019_v57 = vadd.f32 %v1983_v5, %v1899_v50  ;;  %v1884_v53 = vmul.f32 %v3900_v26, %v2651_v16  ;;  %v1380_v55 = vmul.f32 %v3803_v36, %v2632_v9  ;;  %v1984_v33 = vrot.slane %v1923_v44, 1 }
 0x127   : > { %v1596_v43 = vadd.f32 %v1561_v21, %v1476_v14  ;;  %v1341_v31 = vmul.f32 %v3803_v36, %v2630_v8  ;;  %v1381_v58 = vmul.f32 %v3807_v1, %v2632_v9  ;;  %v1833_v20 = vsel %vm617_vm1, %v1830_v7, %v1832_v59 }
 0x128   : > { %v2139_v38 = vadd.f32 %v2103_v40, %v2019_v57  ;;  %v1442_v30 = vrot.slane %v1380_v55, 1  ;;  %v1500_v35 = vmul.f32 %v3803_v36, %v2634_v10  ;;  %v2104_v49 = vrot.slane %v2043_v29, 2 }
 0x129   : > { %v1628_v52 = vadd.f32 %v1612_v63, %v1596_v43  ;;  %v1443_v13 = vrot.slane %v1381_v58, 1  ;;  %v1501_v28 = vmul.f32 %v3807_v1, %v2634_v10  ;;  %v1613_v48 = vmul.f32 %v3896_v61, %v2649_v15 }
 0x12a   : > { %v2155_v24 = vadd.f32 %v3935_v18, %v2139_v38  ;;  %v1562_v19 = vrot.slane %v1500_v35, 2  ;;  %v1652_v7 = vmul.f32 %v3896_v61, %v2643_v11  ;;  %v1653_v42 = vmul.f32 %v3900_v26, %v2643_v11 }
 0x12b   : > { %v1748_v46 = vadd.f32 %v1713_v25, %v1628_v52  ;;  %v1444_v39 = vsel %vm492_vm0, %v1442_v30, %v1443_v13  ;;  %v1563_v36 = vrot.slane %v1501_v28, 2  ;;  %v1772_v54 = vmul.f32 %v3896_v61, %v2645_v12 }
 0x12c   : > { %2381 = vst [vmem:[%s2776_s26 + $0xe0] sm:$0xff] %v2155_v24  ;;  %v1477_v56 = vadd.f32 %v1444_v39, %v1341_v31  ;;  %v1714_v34 = vrot.slane %v1652_v7, 1  ;;  %v1773_v0 = vmul.f32 %v3900_v26, %v2645_v12  ;;  %v1985_v5 = vsel %vm492_vm0, %v1982_v37, %v1984_v33 }
 0x12d   : > { %v1868_v60 = vadd.f32 %v1833_v20, %v1748_v46  ;;  %v1564_v62 = vsel %vm617_vm1, %v1562_v19, %v1563_v36  ;;  %v1715_v27 = vrot.slane %v1653_v42, 1  ;;  %v1834_v63 = vrot.slane %v1772_v54, 2 }
 0x12e   : > { %v1597_v4 = vadd.f32 %v1564_v62, %v1477_v56  ;;  %v1835_v22 = vrot.slane %v1773_v0, 2  ;;  %v1924_v47 = vmul.f32 %v1324_v3, %v2653_v17  ;;  %v1925_v21 = vmul.f32 %v1325_v51, %v2653_v17 }
 0x12f   : > { %v1900_v50 = vadd.f32 %v1884_v53, %v1868_v60  ;;  %v1716_v41 = vsel %vm492_vm0, %v1714_v34, %v1715_v27  ;;  %v2044_v61 = vmul.f32 %v1324_v3, %v2664_v23  ;;  %v2105_v44 = vsel %vm617_vm1, %v2102_v32, %v2104_v49 }
 0x130   : > { %v1629_v37 = vadd.f32 %v1613_v48, %v1597_v4  ;;  %v1885_v40 = vmul.f32 %v1324_v3, %v2651_v16  ;;  %v2045_v14 = vmul.f32 %v1325_v51, %v2664_v23  ;;  %v1836_v29 = vsel %vm617_vm1, %v1834_v63, %v1835_v22 }
 0x131   : > { %v2020_v59 = vadd.f32 %v1985_v5, %v1900_v50  ;;  %v1986_v57 = vrot.slane %v1924_v47, 1  ;;  %v1987_v25 = vrot.slane %v1925_v21, 1  ;;  %v2106_v55 = vrot.slane %v2044_v61, 2 }
 0x132   : > { %v1749_v53 = vadd.f32 %v1716_v41, %v1629_v37  ;;  %v1382_v43 = vmul.f32 %v3841_v2, %v2632_v9  ;;  %v1502_v6 = vmul.f32 %v3841_v2, %v2634_v10  ;;  %v2107_v33 = vrot.slane %v2045_v14, 2  ;;  %v1326_v9 = vld [vmem:[%s3880_s8 + $0x28] sm:$0x3] }
 0x133   : > { %v2140_v32 = vadd.f32 %v2105_v44, %v2020_v59  ;;  %v1342_v31 = vmul.f32 %v3807_v1, %v2630_v8  ;;  %v1654_v58 = vmul.f32 %v3939_v45, %v2643_v11  ;;  %v1988_v52 = vsel %vm492_vm0, %v1986_v57, %v1987_v25 }
 0x134   : > { %v1869_v38 = vadd.f32 %v1836_v29, %v1749_v53  ;;  %v1445_v20 = vrot.slane %v1382_v43, 1  ;;  %v1565_v30 = vrot.slane %v1502_v6, 2  ;;  %v1774_v10 = vmul.f32 %v3939_v45, %v2645_v12 }
 0x135   : > { %v2156_v35 = vadd.f32 %v3935_v18, %v2140_v32  ;;  %v1717_v8 = vrot.slane %v1654_v58, 1  ;;  %v2108_v11 = vsel %vm617_vm1, %v2106_v55, %v2107_v33  ;;  %v1614_v24 = vmul.f32 %v3900_v26, %v2649_v15 }
 0x136   : > { %v1901_v2 = vadd.f32 %v1885_v40, %v1869_v38  ;;  %v1446_v49 = vsel %vm492_vm0, %v1443_v13, %v1445_v20  ;;  %v1566_v28 = vsel %vm617_vm1, %v1563_v36, %v1565_v30  ;;  %v1837_v48 = vrot.slane %v1774_v10, 2 }
 0x137   : > { %2382 = vst [vmem:[%s2776_s26 + $0xe8] sm:$0xff] %v2156_v35  ;;  %v1478_v1 = vadd.f32 %v1446_v49, %v1342_v31  ;;  %v1926_v7 = vmul.f32 %v1326_v9, %v2653_v17  ;;  %v1718_v45 = vsel %vm492_vm0, %v1715_v27, %v1717_v8  ;;  %v2046_v13 = vmul.f32 %v1326_v9, %v2664_v23 }
 0x138   : > { %v2021_v19 = vadd.f32 %v1988_v52, %v1901_v2  ;;  %v1838_v36 = vsel %vm617_vm1, %v1835_v22, %v1837_v48  ;;  %v1886_v26 = vmul.f32 %v1325_v51, %v2651_v16 }
 0x139   : > { %v1598_v46 = vadd.f32 %v1566_v28, %v1478_v1  ;;  %v1989_v42 = vrot.slane %v1926_v7, 1  ;;  %v2109_v17 = vrot.slane %v2046_v13, 2 }
 0x13a   : > { %v2141_v12 = vadd.f32 %v2108_v11, %v2021_v19 }
 0x13b   : > { %v1630_v3 = vadd.f32 %v1614_v24, %v1598_v46  ;;  %v1990_v34 = vsel %vm492_vm0, %v1987_v25, %v1989_v42  ;;  %v2110_v23 = vsel %vm617_vm1, %v2107_v33, %v2109_v17 }
 0x13c   : > { %v2157_v39 = vadd.f32 %v3935_v18, %v2141_v12 }
 0x13d   : > { %v1750_v15 = vadd.f32 %v1718_v45, %v1630_v3 }
 0x13e   : > { %2383 = vst [vmem:[%s2776_s26 + $0xf0] sm:$0xff] %v2157_v39 }
 0x13f   : > { %v1870_v56 = vadd.f32 %v1838_v36, %v1750_v15 }
 0x141   : > { %v1902_v54 = vadd.f32 %v1886_v26, %v1870_v56 }
 0x143   : > { %v2022_v0 = vadd.f32 %v1990_v34, %v1902_v54 }
 0x145   : > { %v2142_v60 = vadd.f32 %v2110_v23, %v2022_v0 }
 0x147   : > { %v2158_v16 = vadd.f32 %v3935_v18, %v2142_v60 }
 0x149   : > { %2384 = vst [vmem:[%s2776_s26 + $0xf8] sm:$0xff] %v2158_v16 }
 0x14a   : > { %2468 = shalt.err (!%p2465_p5)
}
 0x14b   : > { %s2469_s14 = scalar_lea.hbm %s4029_s22, 4096  ;;  %s2473_s7 = scalar_lea.hbm %s4086_s4, 8192 }
 0x14c   : > { %p2470_p6 = scmp.ne.s32.totalorder %s4029_s22, %s2469_s14  ;;  %p2474_p10 = scmp.lt.s32.totalorder %s4029_s22, %s4086_s4 }
 0x14d   : > { %p2475_p11 = scmp.lt.s32.totalorder %s2473_s7, %s2469_s14 }
 0x14e   : > { %p2471_p7 = pnand %p2470_p6, %p2601_p4 }
 0x14f   : > { %p2476_p12 = por %p2475_p11, %p2474_p10 }
 0x150   : > { %p2472_p9 = pneg %p2471_p7 }
 0x152   : > { %p2477_p13 = pnand %p2476_p12, %p2472_p9 }
 0x154   : > { %2480 = shalt.err (!%p2477_p13)
}
 0x155   : > { %s2534_s10 = smov 128   ;;  %s2535_s11 = smov 8  }
 0x156   : > { %2395 = dma.vmem_to_hbm [thread:$0]  (%p2601_p4), %s4031_s12, 4096, %s4029_s22, %s4037_s24, %s2534_s10, %s2534_s10, %s2535_s11  }
 0x157 PF: > { %p2402_p0 = scmp.ge.s32.totalorder %s2531_s20, 2  ;;  %s2209_s13 = sand.u32 1, %s2511_s15  }
 0x158   : > { %s2210_s21 = scalar_lea.sflag [#allocation3], %s2209_s13 }
 0x159   : > { %p2398_p1 = pnand %p2402_p0, %p2608_p8 }
 0x15b   : > { %p2399_p2 = pneg %p2398_p1 }
 0x15d   : > { %2506 = dma.done.wait (%p2399_p2), %s2210_s21, 4096  }
 0x15e   : > { %2508 = vsyncadd (%p2399_p2), %s2210_s21, 4294963200  ;;  %s17_s20 = sadd.s32 1, %s2531_s20   ;;  %s4089_s15 = smov %s2515_s16 }
 0x15f   : > { %p14_p3 = scmp.ge.s32.totalorder %s17_s20, 4   ;;  %s4090_s16 = smov %s2519_s17 }
 0x160   : > { %s4091_s17 = smov %s2614_s28  ;;  %s4092_s18 = smov %s2527_s19 }
 0x161   : > { %s4093_s19 = smov %s4095_s23  ;;  %16 = sbr.rel (!%p14_p3) target bundleno = 4 (0x4), region = 82 }
 0x166   :  { %2215 = vsyncpa [#allocation3], 1 }
 0x167   :  { %2217 = vsyncpa [#allocation3 + $0x1], 1 }

</bundles_post_ra>
